<compile_context>
chip_gen: v7x
topology: tpu7x:2x2x1
jax: 0.10.0
libtpu: 0.0.40
codegen_flags: <defaults>
</compile_context>

<pallas_src>
import jax
import jax.numpy as jnp
from jax.experimental import pallas as pl
from jax.experimental.pallas import tpu as pltpu


def _round_up(x, m):
    return ((x + m - 1) // m) * m


def _scale_mul_kernel(scale_ref, x_ref, o_ref):
    # scale_ref: (TC, 1) column, x_ref: (TC, HW) -> lane-broadcast multiply (VPU).
    o_ref[...] = x_ref[...] * scale_ref[...]


def _scale_mul_resident_kernel(scale_ref, x_ref, o_ref):
    # scale_ref: full (NC_pad, 1) column resident in VMEM for the whole grid
    # (constant index_map => DMA'd exactly once); slice this block's rows.
    tc = x_ref.shape[0]
    start = pl.multiple_of(pl.program_id(0) * tc, 8)
    o_ref[...] = x_ref[...] * scale_ref[pl.ds(start, tc), :]


# All thresholds are in *padded* VMEM bytes (lanes -> 128, rows -> sublane).
_SMALL_MAX_PADDED_BYTES = 6 * 1024 * 1024       # whole-problem, un-pipelined path
_TARGET_BLOCK_PADDED_BYTES = 4 * 1024 * 1024    # per-block footprint, tiled path
_RESIDENT_SCALE_MAX_BYTES = 2 * 1024 * 1024     # keep full scale resident below this
_VMEM_HEADROOM_BYTES = 8 * 1024 * 1024
_VMEM_LIMIT_CAP = 56 * 1024 * 1024              # stay under v7x's 64 MiB physical


def broadcast_mul(x284, x279, donate_x=False):
    """Computes x284 * x279 with x284: (N, C, 1, 1), x279: (N, C, H, W)."""
    n, c, h, w = x279.shape
    assert x284.shape == (n, c, 1, 1)
    # Match PyTorch type promotion (e.g. f32 scale * bf16 activations -> f32).
    out_dtype = jnp.result_type(x284.dtype, x279.dtype)
    nc, hw = n * c, h * w

    x2d = x279.reshape(nc, hw).astype(out_dtype)
    s2d = x284.reshape(nc, 1).astype(out_dtype)

    itemsize = jnp.dtype(out_dtype).itemsize
    sublane = {4: 8, 2: 16, 1: 32}.get(itemsize, 8)
    row_bytes = _round_up(hw, 128) * itemsize                # padded VMEM cost per row
    scale_bytes = _round_up(nc, sublane) * 128 * itemsize    # (nc,1) also lane-pads to 128
    padded_total = 2 * _round_up(nc, sublane) * row_bytes + scale_bytes

    # Alias x2d (arg index 1) to the output when the caller donates it.
    alias = {1: 0} if donate_x else {}

    small = padded_total <= _SMALL_MAX_PADDED_BYTES

    tc = num_blocks = None
    if not small:
        # Tile the channel axis; tc sized from the *padded* block footprint.
        tc = max(sublane, (_TARGET_BLOCK_PADDED_BYTES // row_bytes) // sublane * sublane)
        num_blocks = pl.cdiv(nc, tc)
        if num_blocks < 2 and nc >= 2 * sublane:
            # Keep >=2 tiles so ("parallel",) can split across the v7x cores and
            # the pipeline actually overlaps input/output DMA.
            tc = _round_up(pl.cdiv(nc, 2), sublane)
            num_blocks = pl.cdiv(nc, tc)
        if num_blocks < 2:
            # nc too small to split into row blocks; take the no-grid path.
            # TODO(synk): also tile hw for the (tiny nc, enormous hw) corner case.
            small = True

    if small:
        # Tiny/medium problem: one un-pipelined call, whole arrays in VMEM.
        vmem_limit = min(_VMEM_LIMIT_CAP,
                         max(16 * 1024 * 1024, padded_total + _VMEM_HEADROOM_BYTES))
        out2d = pl.pallas_call(
            _scale_mul_kernel,
            out_shape=jax.ShapeDtypeStruct((nc, hw), out_dtype),
            in_specs=[
                pl.BlockSpec(memory_space=pltpu.MemorySpace.VMEM),
                pl.BlockSpec(memory_space=pltpu.MemorySpace.VMEM),
            ],
            out_specs=pl.BlockSpec(memory_space=pltpu.MemorySpace.VMEM),
            input_output_aliases=alias,
            compiler_params=pltpu.CompilerParams(vmem_limit_bytes=vmem_limit),
        )(s2d, x2d)
        return out2d.reshape(n, c, h, w)

    # ---------------- tiled path ----------------
    block_bytes = tc * row_bytes
    resident = scale_bytes <= _RESIDENT_SCALE_MAX_BYTES
    if resident:
        # Pad the scale so the in-kernel dynamic slice of the last (partial)
        # block never reads out of bounds; it is DMA'd once for the whole grid.
        nc_pad = num_blocks * tc
        if nc_pad > nc:
            s2d = jnp.pad(s2d, ((0, nc_pad - nc), (0, 0)))
        kernel = _scale_mul_resident_kernel
        scale_spec = pl.BlockSpec((nc_pad, 1), lambda i: (0, 0))
        scale_vmem = _round_up(nc_pad, sublane) * 128 * itemsize
    else:
        # Full scale would be too big once lane-padded; DMA a small block per step.
        kernel = _scale_mul_kernel
        scale_spec = pl.BlockSpec((tc, 1), lambda i: (i, 0))
        scale_vmem = 2 * tc * 128 * itemsize  # double-buffered

    # Honest budget: double-buffered in + out blocks, plus the scale.
    vmem_needed = 4 * block_bytes + scale_vmem
    vmem_limit = min(_VMEM_LIMIT_CAP,
                     max(24 * 1024 * 1024, vmem_needed + _VMEM_HEADROOM_BYTES))

    out2d = pl.pallas_call(
        kernel,
        out_shape=jax.ShapeDtypeStruct((nc, hw), out_dtype),
        grid_spec=pl.GridSpec(
            grid=(num_blocks,),
            in_specs=[
                scale_spec,
                pl.BlockSpec((tc, hw), lambda i: (i, 0)),
            ],
            out_specs=pl.BlockSpec((tc, hw), lambda i: (i, 0)),
        ),
        input_output_aliases=alias,
        compiler_params=pltpu.CompilerParams(
            dimension_semantics=("parallel",),
            vmem_limit_bytes=vmem_limit,
        ),
    )(s2d, x2d)
    return out2d.reshape(n, c, h, w)


if __name__ == "__main__":
    key = jax.random.PRNGKey(0)
    k1, k2, k3, k4, k5, k6 = jax.random.split(key, 6)

    # 1) Exact module shape (hits the small, un-pipelined path).
    x279 = jax.random.normal(k1, (1, 1248, 7, 7), dtype=jnp.float32)
    x284 = jax.random.normal(k2, (1, 1248, 1, 1), dtype=jnp.float32)
    out = broadcast_mul(x284, x279)
    jax.block_until_ready(out)
    ref = x284 * x279
    assert out.shape == (1, 1248, 7, 7) and out.dtype == ref.dtype
    assert jnp.allclose(out, ref, atol=1e-6, rtol=1e-6)

    # 2) Larger case exercising the tiled path with the resident-scale kernel.
    xb = jax.random.normal(k3, (1, 4096, 32, 32), dtype=jnp.float32)
    sb = jax.random.normal(k4, (1, 4096, 1, 1), dtype=jnp.float32)
    outb = broadcast_mul(sb, xb)
    jax.block_until_ready(outb)
    assert jnp.allclose(outb, sb * xb, atol=1e-6, rtol=1e-6)

    # 3) Case exercising the tiled path with per-block scale DMA (large nc).
    xc = jax.random.normal(k5, (1, 6144, 7, 7), dtype=jnp.float32)
    sc = jax.random.normal(k6, (1, 6144, 1, 1), dtype=jnp.float32)
    outc = broadcast_mul(sc, xc)
    jax.block_until_ready(outc)
    assert jnp.allclose(outc, sc * xc, atol=1e-6, rtol=1e-6)

    print("KERNEL_OK")
</pallas_src>

<mosaic_0001>
module attributes {stable_mosaic.version = 11 : i64} {
  func.func @_scale_mul_kernel(%arg0: memref<1248x1xf32, #tpu.memory_space<vmem>>, %arg1: memref<1248x49xf32, #tpu.memory_space<vmem>>, %arg2: memref<1248x49xf32, #tpu.memory_space<vmem>>) attributes {dimension_semantics = [], scalar_prefetch = 0 : i64, scratch_operands = 0 : i64, tpu.core_type = #tpu.core_type<tc>} {
    %c0 = arith.constant 0 : index
    %c0_0 = arith.constant 0 : index
    %0 = vector.load %arg1[%c0, %c0_0] : memref<1248x49xf32, #tpu.memory_space<vmem>>, vector<1248x49xf32>
    %c0_1 = arith.constant 0 : index
    %c0_2 = arith.constant 0 : index
    %1 = vector.load %arg0[%c0_1, %c0_2] : memref<1248x1xf32, #tpu.memory_space<vmem>>, vector<1248x1xf32>
    %2 = vector.broadcast %1 : vector<1248x1xf32> to vector<1248x49xf32>
    %3 = arith.mulf %0, %2 : vector<1248x49xf32>
    %c0_3 = arith.constant 0 : index
    %c0_4 = arith.constant 0 : index
    %4 = vector.load %arg2[%c0_3, %c0_4] : memref<1248x49xf32, #tpu.memory_space<vmem>>, vector<1248x49xf32>
    tpu.vector_store %arg2[%c0_3, %c0_4], %3 {strides = array<i32>} : memref<1248x49xf32, #tpu.memory_space<vmem>>, vector<1248x49xf32>,
    return
  }
}

</mosaic_0001>

<bundles_post_ra>
// kernel: tpu_custom_call.1
= control target key start
LH: loop header
LB: loop body
LE: loop exit
PB: predicated region body
PF: predicated region fallthrough
CT: control target
= control target key end

     0   :  { %v1423_v0 = vmov 0   ;;  %vm1259_vm0 = vcmask 400384   ;;  %s2999_s0 = inlined_call_operand.vmem [shape: f32[1248,1], index: 0, kind: input, shape index: {}]   ;;  %s3000_s1 = inlined_call_operand.vmem [shape: f32[1248,49], index: 1, kind: input, shape index: {}]   ;;  %s3001_s2 = inlined_call_operand.vmem [shape: f32[1248,49], index: 2, kind: output, shape index: {}]  }
   0x1   :  { %1422 = vset.pattern.permute.xlu1 %v1423_v0  ;;  %1421 = vset.pattern.permute.xlu0 %v1423_v0  ;;  %v169_v1 = vld [vmem:[%s2999_s0 + $0x10] sm:$0xff]  ;;  %v167_v2 = vld [vmem:[%s2999_s0] sm:$0xff]  ;;  %v170_v3 = vld [vmem:[%s2999_s0 + $0x18] sm:$0xff] }
   0x2   :  { %335 = vperm.xlu1 %1422, %v169_v1   ;;  %325 = vperm.xlu0 %1421, %v167_v2   ;;  %v168_v4 = vld [vmem:[%s2999_s0 + $0x8] sm:$0xff]  ;;  %v171_v6 = vld [vmem:[%s2999_s0 + $0x20] sm:$0xff]  ;;  %v174_v7 = vld [vmem:[%s2999_s0 + $0x38] sm:$0xff] }
   0x3   :  { %v172_v5 = vld [vmem:[%s2999_s0 + $0x28] sm:$0xff]  ;;  %v173_v8 = vld [vmem:[%s2999_s0 + $0x30] sm:$0xff]  ;;  %v175_v10 = vld [vmem:[%s2999_s0 + $0x40] sm:$0xff] }
   0x4   :  { %v176_v9 = vld [vmem:[%s2999_s0 + $0x48] sm:$0xff]  ;;  %v178_v11 = vld [vmem:[%s2999_s0 + $0x58] sm:$0xff]  ;;  %v177_v12 = vld [vmem:[%s2999_s0 + $0x50] sm:$0xff] }
   0x5   :  { %v180_v13 = vld [vmem:[%s2999_s0 + $0x68] sm:$0xff]  ;;  %v179_v14 = vld [vmem:[%s2999_s0 + $0x60] sm:$0xff]  ;;  %v182_v15 = vld [vmem:[%s2999_s0 + $0x78] sm:$0xff] }
   0x6   :  { %340 = vperm.xlu1 %1422, %v170_v3   ;;  %330 = vperm.xlu0 %1421, %v168_v4   ;;  %v181_v16 = vld [vmem:[%s2999_s0 + $0x70] sm:$0xff]  ;;  %v184_v17 = vld [vmem:[%s2999_s0 + $0x88] sm:$0xff]  ;;  %v183_v18 = vld [vmem:[%s2999_s0 + $0x80] sm:$0xff] }
   0x7   :  { %v186_v19 = vld [vmem:[%s2999_s0 + $0x98] sm:$0xff]  ;;  %v185_v20 = vld [vmem:[%s2999_s0 + $0x90] sm:$0xff]  ;;  %v188_v21 = vld [vmem:[%s2999_s0 + $0xa8] sm:$0xff] }
   0x8   :  { %v187_v22 = vld [vmem:[%s2999_s0 + $0xa0] sm:$0xff]  ;;  %v190_v23 = vld [vmem:[%s2999_s0 + $0xb8] sm:$0xff]  ;;  %v189_v24 = vld [vmem:[%s2999_s0 + $0xb0] sm:$0xff] }
   0x9   :  { %v192_v25 = vld [vmem:[%s2999_s0 + $0xc8] sm:$0xff]  ;;  %v191_v26 = vld [vmem:[%s2999_s0 + $0xc0] sm:$0xff]  ;;  %v194_v27 = vld [vmem:[%s2999_s0 + $0xd8] sm:$0xff] }
   0xa   :  { %350 = vperm.xlu1 %1422, %v172_v5   ;;  %345 = vperm.xlu0 %1421, %v171_v6   ;;  %v193_v28 = vld [vmem:[%s2999_s0 + $0xd0] sm:$0xff]  ;;  %v196_v29 = vld [vmem:[%s2999_s0 + $0xe8] sm:$0xff]  ;;  %v195_v30 = vld [vmem:[%s2999_s0 + $0xe0] sm:$0xff] }
   0xb   :  { %v198_v31 = vld [vmem:[%s2999_s0 + $0xf8] sm:$0xff]  ;;  %v197_v32 = vld [vmem:[%s2999_s0 + $0xf0] sm:$0xff]  ;;  %v200_v33 = vld [vmem:[%s2999_s0 + $0x108] sm:$0xff] }
   0xc   :  { %v199_v34 = vld [vmem:[%s2999_s0 + $0x100] sm:$0xff]  ;;  %v202_v35 = vld [vmem:[%s2999_s0 + $0x118] sm:$0xff]  ;;  %v201_v36 = vld [vmem:[%s2999_s0 + $0x110] sm:$0xff] }
   0xd   :  { %v204_v37 = vld [vmem:[%s2999_s0 + $0x128] sm:$0xff]  ;;  %v203_v38 = vld [vmem:[%s2999_s0 + $0x120] sm:$0xff]  ;;  %v206_v39 = vld [vmem:[%s2999_s0 + $0x138] sm:$0xff] }
   0xe   :  { %360 = vperm.xlu1 %1422, %v174_v7   ;;  %355 = vperm.xlu0 %1421, %v173_v8   ;;  %v205_v40 = vld [vmem:[%s2999_s0 + $0x130] sm:$0xff]  ;;  %v208_v41 = vld [vmem:[%s2999_s0 + $0x148] sm:$0xff]  ;;  %v207_v42 = vld [vmem:[%s2999_s0 + $0x140] sm:$0xff] }
   0xf   :  { %v210_v43 = vld [vmem:[%s2999_s0 + $0x158] sm:$0xff]  ;;  %v209_v44 = vld [vmem:[%s2999_s0 + $0x150] sm:$0xff]  ;;  %v212_v45 = vld [vmem:[%s2999_s0 + $0x168] sm:$0xff] }
  0x10   :  { %v211_v46 = vld [vmem:[%s2999_s0 + $0x160] sm:$0xff]  ;;  %v214_v47 = vld [vmem:[%s2999_s0 + $0x178] sm:$0xff]  ;;  %v213_v48 = vld [vmem:[%s2999_s0 + $0x170] sm:$0xff] }
  0x11   :  { %v216_v49 = vld [vmem:[%s2999_s0 + $0x188] sm:$0xff]  ;;  %v215_v50 = vld [vmem:[%s2999_s0 + $0x180] sm:$0xff]  ;;  %v218_v51 = vld [vmem:[%s2999_s0 + $0x198] sm:$0xff] }
  0x12   :  { %370 = vperm.xlu1 %1422, %v176_v9   ;;  %365 = vperm.xlu0 %1421, %v175_v10   ;;  %v217_v52 = vld [vmem:[%s2999_s0 + $0x190] sm:$0xff]  ;;  %v220_v53 = vld [vmem:[%s2999_s0 + $0x1a8] sm:$0xff]  ;;  %v219_v54 = vld [vmem:[%s2999_s0 + $0x1a0] sm:$0xff] }
  0x13   :  { %v222_v55 = vld [vmem:[%s2999_s0 + $0x1b8] sm:$0xff]  ;;  %v221_v56 = vld [vmem:[%s2999_s0 + $0x1b0] sm:$0xff]  ;;  %v224_v57 = vld [vmem:[%s2999_s0 + $0x1c8] sm:$0xff] }
  0x14   :  { %v223_v58 = vld [vmem:[%s2999_s0 + $0x1c0] sm:$0xff]  ;;  %v226_v59 = vld [vmem:[%s2999_s0 + $0x1d8] sm:$0xff]  ;;  %v225_v60 = vld [vmem:[%s2999_s0 + $0x1d0] sm:$0xff] }
  0x15   :  { %v228_v61 = vld [vmem:[%s2999_s0 + $0x1e8] sm:$0xff]  ;;  %v227_v62 = vld [vmem:[%s2999_s0 + $0x1e0] sm:$0xff]  ;;  %v230_v63 = vld [vmem:[%s2999_s0 + $0x1f8] sm:$0xff] }
  0x16   :  { %380 = vperm.xlu1 %1422, %v178_v11   ;;  %375 = vperm.xlu0 %1421, %v177_v12   ;;  %v229_v0 = vld [vmem:[%s2999_s0 + $0x1f0] sm:$0xff]  ;;  %v11_v2 = vld [vmem:[%s3000_s1] sm:$0xff]  ;;  %v232_v3 = vld [vmem:[%s2999_s0 + $0x208] sm:$0xff] }
  0x17   :  { %v13_v1 = vld [vmem:[%s3000_s1 + $0x10] sm:$0xff]  ;;  %v231_v4 = vld [vmem:[%s2999_s0 + $0x200] sm:$0xff]  ;;  %v14_v9 = vld [vmem:[%s3000_s1 + $0x18] sm:$0xff] }
  0x18   :  { %v12_v10 = vld [vmem:[%s3000_s1 + $0x8] sm:$0xff]  ;;  %v234_v11 = vld [vmem:[%s2999_s0 + $0x218] sm:$0xff]  ;;  %v233_v12 = vld [vmem:[%s2999_s0 + $0x210] sm:$0xff] }
  0x1a   :  { %390 = vperm.xlu1 %1422, %v180_v13   ;;  %385 = vperm.xlu0 %1421, %v179_v14  }
  0x1e   :  { %400 = vperm.xlu1 %1422, %v182_v15   ;;  %395 = vperm.xlu0 %1421, %v181_v16  }
  0x22   :  { %410 = vperm.xlu1 %1422, %v184_v17   ;;  %405 = vperm.xlu0 %1421, %v183_v18   ;;  %v16_v17 = vld [vmem:[%s3000_s1 + $0x28] sm:$0xff]  ;;  %v15_v18 = vld [vmem:[%s3000_s1 + $0x20] sm:$0xff] }
  0x26   :  { %420 = vperm.xlu1 %1422, %v186_v19   ;;  %415 = vperm.xlu0 %1421, %v185_v20   ;;  %v236_v19 = vld [vmem:[%s2999_s0 + $0x228] sm:$0xff]  ;;  %v235_v20 = vld [vmem:[%s2999_s0 + $0x220] sm:$0xff] }
  0x2a   :  { %430 = vperm.xlu1 %1422, %v188_v21   ;;  %425 = vperm.xlu0 %1421, %v187_v22  }
  0x2e   :  { %440 = vperm.xlu1 %1422, %v190_v23   ;;  %435 = vperm.xlu0 %1421, %v189_v24  }
  0x32   :  { %450 = vperm.xlu1 %1422, %v192_v25   ;;  %445 = vperm.xlu0 %1421, %v191_v26   ;;  %v18_v25 = vld [vmem:[%s3000_s1 + $0x38] sm:$0xff]  ;;  %v17_v26 = vld [vmem:[%s3000_s1 + $0x30] sm:$0xff] }
  0x36   :  { %460 = vperm.xlu1 %1422, %v194_v27   ;;  %455 = vperm.xlu0 %1421, %v193_v28   ;;  %v238_v27 = vld [vmem:[%s2999_s0 + $0x238] sm:$0xff]  ;;  %v237_v28 = vld [vmem:[%s2999_s0 + $0x230] sm:$0xff] }
  0x3a   :  { %470 = vperm.xlu1 %1422, %v196_v29   ;;  %465 = vperm.xlu0 %1421, %v195_v30  }
  0x3e   :  { %480 = vperm.xlu1 %1422, %v198_v31   ;;  %475 = vperm.xlu0 %1421, %v197_v32  }
  0x42   :  { %490 = vperm.xlu1 %1422, %v200_v33   ;;  %485 = vperm.xlu0 %1421, %v199_v34   ;;  %v20_v33 = vld [vmem:[%s3000_s1 + $0x48] sm:$0xff]  ;;  %v19_v34 = vld [vmem:[%s3000_s1 + $0x40] sm:$0xff] }
  0x46   :  { %500 = vperm.xlu1 %1422, %v202_v35   ;;  %495 = vperm.xlu0 %1421, %v201_v36   ;;  %v240_v35 = vld [vmem:[%s2999_s0 + $0x248] sm:$0xff]  ;;  %v239_v36 = vld [vmem:[%s2999_s0 + $0x240] sm:$0xff] }
  0x4a   :  { %510 = vperm.xlu1 %1422, %v204_v37   ;;  %505 = vperm.xlu0 %1421, %v203_v38  }
  0x4e   :  { %520 = vperm.xlu1 %1422, %v206_v39   ;;  %515 = vperm.xlu0 %1421, %v205_v40  }
  0x52   :  { %530 = vperm.xlu1 %1422, %v208_v41   ;;  %525 = vperm.xlu0 %1421, %v207_v42   ;;  %v22_v41 = vld [vmem:[%s3000_s1 + $0x58] sm:$0xff]  ;;  %v21_v42 = vld [vmem:[%s3000_s1 + $0x50] sm:$0xff] }
  0x56   :  { %540 = vperm.xlu1 %1422, %v210_v43   ;;  %535 = vperm.xlu0 %1421, %v209_v44   ;;  %v242_v43 = vld [vmem:[%s2999_s0 + $0x258] sm:$0xff]  ;;  %v241_v44 = vld [vmem:[%s2999_s0 + $0x250] sm:$0xff] }
  0x5a   :  { %550 = vperm.xlu1 %1422, %v212_v45   ;;  %545 = vperm.xlu0 %1421, %v211_v46  }
  0x5e   :  { %560 = vperm.xlu1 %1422, %v214_v47   ;;  %555 = vperm.xlu0 %1421, %v213_v48  }
  0x62   :  { %570 = vperm.xlu1 %1422, %v216_v49   ;;  %565 = vperm.xlu0 %1421, %v215_v50   ;;  %v24_v49 = vld [vmem:[%s3000_s1 + $0x68] sm:$0xff]  ;;  %v23_v50 = vld [vmem:[%s3000_s1 + $0x60] sm:$0xff] }
  0x66   :  { %580 = vperm.xlu1 %1422, %v218_v51   ;;  %575 = vperm.xlu0 %1421, %v217_v52   ;;  %v244_v51 = vld [vmem:[%s2999_s0 + $0x268] sm:$0xff]  ;;  %v243_v52 = vld [vmem:[%s2999_s0 + $0x260] sm:$0xff] }
  0x6a   :  { %590 = vperm.xlu1 %1422, %v220_v53   ;;  %585 = vperm.xlu0 %1421, %v219_v54  }
  0x6e   :  { %600 = vperm.xlu1 %1422, %v222_v55   ;;  %595 = vperm.xlu0 %1421, %v221_v56  }
  0x72   :  { %610 = vperm.xlu1 %1422, %v224_v57   ;;  %605 = vperm.xlu0 %1421, %v223_v58   ;;  %v26_v57 = vld [vmem:[%s3000_s1 + $0x78] sm:$0xff]  ;;  %v25_v58 = vld [vmem:[%s3000_s1 + $0x70] sm:$0xff] }
  0x76   :  { %620 = vperm.xlu1 %1422, %v226_v59   ;;  %615 = vperm.xlu0 %1421, %v225_v60   ;;  %v246_v59 = vld [vmem:[%s2999_s0 + $0x278] sm:$0xff]  ;;  %v245_v60 = vld [vmem:[%s2999_s0 + $0x270] sm:$0xff] }
  0x7a   :  { %630 = vperm.xlu1 %1422, %v228_v61   ;;  %625 = vperm.xlu0 %1421, %v227_v62  }
  0x7e   :  { %640 = vperm.xlu1 %1422, %v230_v63   ;;  %635 = vperm.xlu0 %1421, %v229_v0  }
  0x81   :  { %v336_v5 = vpop.permute.xlu1 %335  ;;  %v326_v6 = vpop.permute.xlu0 %325 }
  0x82   :  { %v1105_v7 = vmul.f32 %v336_v5, %v13_v1  ;;  %v1103_v8 = vmul.f32 %v326_v6, %v11_v2  ;;  %650 = vperm.xlu1 %1422, %v232_v3   ;;  %645 = vperm.xlu0 %1421, %v231_v4   ;;  %v28_v1 = vld [vmem:[%s3000_s1 + $0x88] sm:$0xff]  ;;  %v27_v2 = vld [vmem:[%s3000_s1 + $0x80] sm:$0xff] }
  0x83   :  { %v248_v3 = vld [vmem:[%s2999_s0 + $0x288] sm:$0xff]  ;;  %v247_v4 = vld [vmem:[%s2999_s0 + $0x280] sm:$0xff] }
  0x84   :  { %1262 = vst.msk [vmem:[%s3001_s2 + $0x10] sm:$0xff] %vm1259_vm0, %v1105_v7  ;;  %1260 = vst.msk [vmem:[%s3001_s2] sm:$0xff] %vm1259_vm0, %v1103_v8 }
  0x85   :  { %v341_v13 = vpop.permute.xlu1 %340  ;;  %v331_v14 = vpop.permute.xlu0 %330 }
  0x86   :  { %v1106_v15 = vmul.f32 %v341_v13, %v14_v9  ;;  %v1104_v16 = vmul.f32 %v331_v14, %v12_v10  ;;  %660 = vperm.xlu1 %1422, %v234_v11   ;;  %655 = vperm.xlu0 %1421, %v233_v12   ;;  %v30_v9 = vld [vmem:[%s3000_s1 + $0x98] sm:$0xff]  ;;  %v29_v10 = vld [vmem:[%s3000_s1 + $0x90] sm:$0xff] }
  0x87   :  { %v250_v11 = vld [vmem:[%s2999_s0 + $0x298] sm:$0xff]  ;;  %v249_v12 = vld [vmem:[%s2999_s0 + $0x290] sm:$0xff] }
  0x88   :  { %1263 = vst.msk [vmem:[%s3001_s2 + $0x18] sm:$0xff] %vm1259_vm0, %v1106_v15  ;;  %1261 = vst.msk [vmem:[%s3001_s2 + $0x8] sm:$0xff] %vm1259_vm0, %v1104_v16 }
  0x89   :  { %v351_v21 = vpop.permute.xlu1 %350  ;;  %v346_v22 = vpop.permute.xlu0 %345 }
  0x8a   :  { %v1108_v23 = vmul.f32 %v351_v21, %v16_v17  ;;  %v1107_v24 = vmul.f32 %v346_v22, %v15_v18  ;;  %670 = vperm.xlu1 %1422, %v236_v19   ;;  %665 = vperm.xlu0 %1421, %v235_v20   ;;  %v32_v17 = vld [vmem:[%s3000_s1 + $0xa8] sm:$0xff]  ;;  %v31_v18 = vld [vmem:[%s3000_s1 + $0xa0] sm:$0xff] }
  0x8b   :  { %v252_v19 = vld [vmem:[%s2999_s0 + $0x2a8] sm:$0xff]  ;;  %v251_v20 = vld [vmem:[%s2999_s0 + $0x2a0] sm:$0xff] }
  0x8c   :  { %1265 = vst.msk [vmem:[%s3001_s2 + $0x28] sm:$0xff] %vm1259_vm0, %v1108_v23  ;;  %1264 = vst.msk [vmem:[%s3001_s2 + $0x20] sm:$0xff] %vm1259_vm0, %v1107_v24 }
  0x8d   :  { %v361_v29 = vpop.permute.xlu1 %360  ;;  %v356_v30 = vpop.permute.xlu0 %355 }
  0x8e   :  { %v1110_v31 = vmul.f32 %v361_v29, %v18_v25  ;;  %v1109_v32 = vmul.f32 %v356_v30, %v17_v26  ;;  %680 = vperm.xlu1 %1422, %v238_v27   ;;  %675 = vperm.xlu0 %1421, %v237_v28   ;;  %v34_v25 = vld [vmem:[%s3000_s1 + $0xb8] sm:$0xff]  ;;  %v33_v26 = vld [vmem:[%s3000_s1 + $0xb0] sm:$0xff] }
  0x8f   :  { %v254_v27 = vld [vmem:[%s2999_s0 + $0x2b8] sm:$0xff]  ;;  %v253_v28 = vld [vmem:[%s2999_s0 + $0x2b0] sm:$0xff] }
  0x90   :  { %1267 = vst.msk [vmem:[%s3001_s2 + $0x38] sm:$0xff] %vm1259_vm0, %v1110_v31  ;;  %1266 = vst.msk [vmem:[%s3001_s2 + $0x30] sm:$0xff] %vm1259_vm0, %v1109_v32 }
  0x91   :  { %v371_v37 = vpop.permute.xlu1 %370  ;;  %v366_v38 = vpop.permute.xlu0 %365 }
  0x92   :  { %v1112_v39 = vmul.f32 %v371_v37, %v20_v33  ;;  %v1111_v40 = vmul.f32 %v366_v38, %v19_v34  ;;  %690 = vperm.xlu1 %1422, %v240_v35   ;;  %685 = vperm.xlu0 %1421, %v239_v36   ;;  %v36_v33 = vld [vmem:[%s3000_s1 + $0xc8] sm:$0xff]  ;;  %v35_v34 = vld [vmem:[%s3000_s1 + $0xc0] sm:$0xff] }
  0x93   :  { %v256_v35 = vld [vmem:[%s2999_s0 + $0x2c8] sm:$0xff]  ;;  %v255_v36 = vld [vmem:[%s2999_s0 + $0x2c0] sm:$0xff] }
  0x94   :  { %1269 = vst.msk [vmem:[%s3001_s2 + $0x48] sm:$0xff] %vm1259_vm0, %v1112_v39  ;;  %1268 = vst.msk [vmem:[%s3001_s2 + $0x40] sm:$0xff] %vm1259_vm0, %v1111_v40 }
  0x95   :  { %v381_v45 = vpop.permute.xlu1 %380  ;;  %v376_v46 = vpop.permute.xlu0 %375 }
  0x96   :  { %v1114_v47 = vmul.f32 %v381_v45, %v22_v41  ;;  %v1113_v48 = vmul.f32 %v376_v46, %v21_v42  ;;  %700 = vperm.xlu1 %1422, %v242_v43   ;;  %695 = vperm.xlu0 %1421, %v241_v44   ;;  %v38_v41 = vld [vmem:[%s3000_s1 + $0xd8] sm:$0xff]  ;;  %v37_v42 = vld [vmem:[%s3000_s1 + $0xd0] sm:$0xff] }
  0x97   :  { %v258_v43 = vld [vmem:[%s2999_s0 + $0x2d8] sm:$0xff]  ;;  %v257_v44 = vld [vmem:[%s2999_s0 + $0x2d0] sm:$0xff] }
  0x98   :  { %1271 = vst.msk [vmem:[%s3001_s2 + $0x58] sm:$0xff] %vm1259_vm0, %v1114_v47  ;;  %1270 = vst.msk [vmem:[%s3001_s2 + $0x50] sm:$0xff] %vm1259_vm0, %v1113_v48 }
  0x99   :  { %v391_v53 = vpop.permute.xlu1 %390  ;;  %v386_v54 = vpop.permute.xlu0 %385 }
  0x9a   :  { %v1116_v55 = vmul.f32 %v391_v53, %v24_v49  ;;  %v1115_v56 = vmul.f32 %v386_v54, %v23_v50  ;;  %710 = vperm.xlu1 %1422, %v244_v51   ;;  %705 = vperm.xlu0 %1421, %v243_v52   ;;  %v40_v49 = vld [vmem:[%s3000_s1 + $0xe8] sm:$0xff]  ;;  %v39_v50 = vld [vmem:[%s3000_s1 + $0xe0] sm:$0xff] }
  0x9b   :  { %v260_v51 = vld [vmem:[%s2999_s0 + $0x2e8] sm:$0xff]  ;;  %v259_v52 = vld [vmem:[%s2999_s0 + $0x2e0] sm:$0xff] }
  0x9c   :  { %1273 = vst.msk [vmem:[%s3001_s2 + $0x68] sm:$0xff] %vm1259_vm0, %v1116_v55  ;;  %1272 = vst.msk [vmem:[%s3001_s2 + $0x60] sm:$0xff] %vm1259_vm0, %v1115_v56 }
  0x9d   :  { %v401_v61 = vpop.permute.xlu1 %400  ;;  %v396_v62 = vpop.permute.xlu0 %395 }
  0x9e   :  { %v1118_v63 = vmul.f32 %v401_v61, %v26_v57  ;;  %v1117_v0 = vmul.f32 %v396_v62, %v25_v58  ;;  %720 = vperm.xlu1 %1422, %v246_v59   ;;  %715 = vperm.xlu0 %1421, %v245_v60   ;;  %v42_v57 = vld [vmem:[%s3000_s1 + $0xf8] sm:$0xff]  ;;  %v41_v58 = vld [vmem:[%s3000_s1 + $0xf0] sm:$0xff] }
  0x9f   :  { %v262_v59 = vld [vmem:[%s2999_s0 + $0x2f8] sm:$0xff]  ;;  %v261_v60 = vld [vmem:[%s2999_s0 + $0x2f0] sm:$0xff] }
  0xa0   :  { %1275 = vst.msk [vmem:[%s3001_s2 + $0x78] sm:$0xff] %vm1259_vm0, %v1118_v63  ;;  %1274 = vst.msk [vmem:[%s3001_s2 + $0x70] sm:$0xff] %vm1259_vm0, %v1117_v0 }
  0xa1   :  { %v411_v5 = vpop.permute.xlu1 %410  ;;  %v406_v6 = vpop.permute.xlu0 %405 }
  0xa2   :  { %v1120_v7 = vmul.f32 %v411_v5, %v28_v1  ;;  %v1119_v8 = vmul.f32 %v406_v6, %v27_v2  ;;  %730 = vperm.xlu1 %1422, %v248_v3   ;;  %725 = vperm.xlu0 %1421, %v247_v4   ;;  %v44_v1 = vld [vmem:[%s3000_s1 + $0x108] sm:$0xff]  ;;  %v43_v2 = vld [vmem:[%s3000_s1 + $0x100] sm:$0xff] }
  0xa3   :  { %v264_v3 = vld [vmem:[%s2999_s0 + $0x308] sm:$0xff]  ;;  %v263_v4 = vld [vmem:[%s2999_s0 + $0x300] sm:$0xff] }
  0xa4   :  { %1277 = vst.msk [vmem:[%s3001_s2 + $0x88] sm:$0xff] %vm1259_vm0, %v1120_v7  ;;  %1276 = vst.msk [vmem:[%s3001_s2 + $0x80] sm:$0xff] %vm1259_vm0, %v1119_v8 }
  0xa5   :  { %v421_v13 = vpop.permute.xlu1 %420  ;;  %v416_v14 = vpop.permute.xlu0 %415 }
  0xa6   :  { %v1122_v15 = vmul.f32 %v421_v13, %v30_v9  ;;  %v1121_v16 = vmul.f32 %v416_v14, %v29_v10  ;;  %740 = vperm.xlu1 %1422, %v250_v11   ;;  %735 = vperm.xlu0 %1421, %v249_v12   ;;  %v46_v9 = vld [vmem:[%s3000_s1 + $0x118] sm:$0xff]  ;;  %v45_v10 = vld [vmem:[%s3000_s1 + $0x110] sm:$0xff] }
  0xa7   :  { %v266_v11 = vld [vmem:[%s2999_s0 + $0x318] sm:$0xff]  ;;  %v265_v12 = vld [vmem:[%s2999_s0 + $0x310] sm:$0xff] }
  0xa8   :  { %1279 = vst.msk [vmem:[%s3001_s2 + $0x98] sm:$0xff] %vm1259_vm0, %v1122_v15  ;;  %1278 = vst.msk [vmem:[%s3001_s2 + $0x90] sm:$0xff] %vm1259_vm0, %v1121_v16 }
  0xa9   :  { %v431_v21 = vpop.permute.xlu1 %430  ;;  %v426_v22 = vpop.permute.xlu0 %425 }
  0xaa   :  { %v1124_v23 = vmul.f32 %v431_v21, %v32_v17  ;;  %v1123_v24 = vmul.f32 %v426_v22, %v31_v18  ;;  %750 = vperm.xlu1 %1422, %v252_v19   ;;  %745 = vperm.xlu0 %1421, %v251_v20   ;;  %v48_v17 = vld [vmem:[%s3000_s1 + $0x128] sm:$0xff]  ;;  %v47_v18 = vld [vmem:[%s3000_s1 + $0x120] sm:$0xff] }
  0xab   :  { %v268_v19 = vld [vmem:[%s2999_s0 + $0x328] sm:$0xff]  ;;  %v267_v20 = vld [vmem:[%s2999_s0 + $0x320] sm:$0xff] }
  0xac   :  { %1281 = vst.msk [vmem:[%s3001_s2 + $0xa8] sm:$0xff] %vm1259_vm0, %v1124_v23  ;;  %1280 = vst.msk [vmem:[%s3001_s2 + $0xa0] sm:$0xff] %vm1259_vm0, %v1123_v24 }
  0xad   :  { %v441_v29 = vpop.permute.xlu1 %440  ;;  %v436_v30 = vpop.permute.xlu0 %435 }
  0xae   :  { %v1126_v31 = vmul.f32 %v441_v29, %v34_v25  ;;  %v1125_v32 = vmul.f32 %v436_v30, %v33_v26  ;;  %760 = vperm.xlu1 %1422, %v254_v27   ;;  %755 = vperm.xlu0 %1421, %v253_v28   ;;  %v50_v25 = vld [vmem:[%s3000_s1 + $0x138] sm:$0xff]  ;;  %v49_v26 = vld [vmem:[%s3000_s1 + $0x130] sm:$0xff] }
  0xaf   :  { %v270_v27 = vld [vmem:[%s2999_s0 + $0x338] sm:$0xff]  ;;  %v269_v28 = vld [vmem:[%s2999_s0 + $0x330] sm:$0xff] }
  0xb0   :  { %1283 = vst.msk [vmem:[%s3001_s2 + $0xb8] sm:$0xff] %vm1259_vm0, %v1126_v31  ;;  %1282 = vst.msk [vmem:[%s3001_s2 + $0xb0] sm:$0xff] %vm1259_vm0, %v1125_v32 }
  0xb1   :  { %v451_v37 = vpop.permute.xlu1 %450  ;;  %v446_v38 = vpop.permute.xlu0 %445 }
  0xb2   :  { %v1128_v39 = vmul.f32 %v451_v37, %v36_v33  ;;  %v1127_v40 = vmul.f32 %v446_v38, %v35_v34  ;;  %770 = vperm.xlu1 %1422, %v256_v35   ;;  %765 = vperm.xlu0 %1421, %v255_v36   ;;  %v52_v33 = vld [vmem:[%s3000_s1 + $0x148] sm:$0xff]  ;;  %v51_v34 = vld [vmem:[%s3000_s1 + $0x140] sm:$0xff] }
  0xb3   :  { %v272_v35 = vld [vmem:[%s2999_s0 + $0x348] sm:$0xff]  ;;  %v271_v36 = vld [vmem:[%s2999_s0 + $0x340] sm:$0xff] }
  0xb4   :  { %1285 = vst.msk [vmem:[%s3001_s2 + $0xc8] sm:$0xff] %vm1259_vm0, %v1128_v39  ;;  %1284 = vst.msk [vmem:[%s3001_s2 + $0xc0] sm:$0xff] %vm1259_vm0, %v1127_v40 }
  0xb5   :  { %v461_v45 = vpop.permute.xlu1 %460  ;;  %v456_v46 = vpop.permute.xlu0 %455 }
  0xb6   :  { %v1130_v47 = vmul.f32 %v461_v45, %v38_v41  ;;  %v1129_v48 = vmul.f32 %v456_v46, %v37_v42  ;;  %780 = vperm.xlu1 %1422, %v258_v43   ;;  %775 = vperm.xlu0 %1421, %v257_v44   ;;  %v54_v41 = vld [vmem:[%s3000_s1 + $0x158] sm:$0xff]  ;;  %v53_v42 = vld [vmem:[%s3000_s1 + $0x150] sm:$0xff] }
  0xb7   :  { %v274_v43 = vld [vmem:[%s2999_s0 + $0x358] sm:$0xff]  ;;  %v273_v44 = vld [vmem:[%s2999_s0 + $0x350] sm:$0xff] }
  0xb8   :  { %1287 = vst.msk [vmem:[%s3001_s2 + $0xd8] sm:$0xff] %vm1259_vm0, %v1130_v47  ;;  %1286 = vst.msk [vmem:[%s3001_s2 + $0xd0] sm:$0xff] %vm1259_vm0, %v1129_v48 }
  0xb9   :  { %v471_v53 = vpop.permute.xlu1 %470  ;;  %v466_v54 = vpop.permute.xlu0 %465 }
  0xba   :  { %v1132_v55 = vmul.f32 %v471_v53, %v40_v49  ;;  %v1131_v56 = vmul.f32 %v466_v54, %v39_v50  ;;  %790 = vperm.xlu1 %1422, %v260_v51   ;;  %785 = vperm.xlu0 %1421, %v259_v52   ;;  %v56_v49 = vld [vmem:[%s3000_s1 + $0x168] sm:$0xff]  ;;  %v55_v50 = vld [vmem:[%s3000_s1 + $0x160] sm:$0xff] }
  0xbb   :  { %v276_v51 = vld [vmem:[%s2999_s0 + $0x368] sm:$0xff]  ;;  %v275_v52 = vld [vmem:[%s2999_s0 + $0x360] sm:$0xff] }
  0xbc   :  { %1289 = vst.msk [vmem:[%s3001_s2 + $0xe8] sm:$0xff] %vm1259_vm0, %v1132_v55  ;;  %1288 = vst.msk [vmem:[%s3001_s2 + $0xe0] sm:$0xff] %vm1259_vm0, %v1131_v56 }
  0xbd   :  { %v481_v61 = vpop.permute.xlu1 %480  ;;  %v476_v62 = vpop.permute.xlu0 %475 }
  0xbe   :  { %v1134_v63 = vmul.f32 %v481_v61, %v42_v57  ;;  %v1133_v0 = vmul.f32 %v476_v62, %v41_v58  ;;  %800 = vperm.xlu1 %1422, %v262_v59   ;;  %795 = vperm.xlu0 %1421, %v261_v60   ;;  %v58_v57 = vld [vmem:[%s3000_s1 + $0x178] sm:$0xff]  ;;  %v57_v58 = vld [vmem:[%s3000_s1 + $0x170] sm:$0xff] }
  0xbf   :  { %v278_v59 = vld [vmem:[%s2999_s0 + $0x378] sm:$0xff]  ;;  %v277_v60 = vld [vmem:[%s2999_s0 + $0x370] sm:$0xff] }
  0xc0   :  { %1291 = vst.msk [vmem:[%s3001_s2 + $0xf8] sm:$0xff] %vm1259_vm0, %v1134_v63  ;;  %1290 = vst.msk [vmem:[%s3001_s2 + $0xf0] sm:$0xff] %vm1259_vm0, %v1133_v0 }
  0xc1   :  { %v491_v5 = vpop.permute.xlu1 %490  ;;  %v486_v6 = vpop.permute.xlu0 %485 }
  0xc2   :  { %v1136_v7 = vmul.f32 %v491_v5, %v44_v1  ;;  %v1135_v8 = vmul.f32 %v486_v6, %v43_v2  ;;  %810 = vperm.xlu1 %1422, %v264_v3   ;;  %805 = vperm.xlu0 %1421, %v263_v4   ;;  %v60_v1 = vld [vmem:[%s3000_s1 + $0x188] sm:$0xff]  ;;  %v59_v2 = vld [vmem:[%s3000_s1 + $0x180] sm:$0xff] }
  0xc3   :  { %v280_v3 = vld [vmem:[%s2999_s0 + $0x388] sm:$0xff]  ;;  %v279_v4 = vld [vmem:[%s2999_s0 + $0x380] sm:$0xff] }
  0xc4   :  { %1293 = vst.msk [vmem:[%s3001_s2 + $0x108] sm:$0xff] %vm1259_vm0, %v1136_v7  ;;  %1292 = vst.msk [vmem:[%s3001_s2 + $0x100] sm:$0xff] %vm1259_vm0, %v1135_v8 }
  0xc5   :  { %v501_v13 = vpop.permute.xlu1 %500  ;;  %v496_v14 = vpop.permute.xlu0 %495 }
  0xc6   :  { %v1138_v15 = vmul.f32 %v501_v13, %v46_v9  ;;  %v1137_v16 = vmul.f32 %v496_v14, %v45_v10  ;;  %820 = vperm.xlu1 %1422, %v266_v11   ;;  %815 = vperm.xlu0 %1421, %v265_v12   ;;  %v62_v9 = vld [vmem:[%s3000_s1 + $0x198] sm:$0xff]  ;;  %v61_v10 = vld [vmem:[%s3000_s1 + $0x190] sm:$0xff] }
  0xc7   :  { %v282_v11 = vld [vmem:[%s2999_s0 + $0x398] sm:$0xff]  ;;  %v281_v12 = vld [vmem:[%s2999_s0 + $0x390] sm:$0xff] }
  0xc8   :  { %1295 = vst.msk [vmem:[%s3001_s2 + $0x118] sm:$0xff] %vm1259_vm0, %v1138_v15  ;;  %1294 = vst.msk [vmem:[%s3001_s2 + $0x110] sm:$0xff] %vm1259_vm0, %v1137_v16 }
  0xc9   :  { %v511_v21 = vpop.permute.xlu1 %510  ;;  %v506_v22 = vpop.permute.xlu0 %505 }
  0xca   :  { %v1140_v23 = vmul.f32 %v511_v21, %v48_v17  ;;  %v1139_v24 = vmul.f32 %v506_v22, %v47_v18  ;;  %830 = vperm.xlu1 %1422, %v268_v19   ;;  %825 = vperm.xlu0 %1421, %v267_v20   ;;  %v64_v17 = vld [vmem:[%s3000_s1 + $0x1a8] sm:$0xff]  ;;  %v63_v18 = vld [vmem:[%s3000_s1 + $0x1a0] sm:$0xff] }
  0xcb   :  { %v284_v19 = vld [vmem:[%s2999_s0 + $0x3a8] sm:$0xff]  ;;  %v283_v20 = vld [vmem:[%s2999_s0 + $0x3a0] sm:$0xff] }
  0xcc   :  { %1297 = vst.msk [vmem:[%s3001_s2 + $0x128] sm:$0xff] %vm1259_vm0, %v1140_v23  ;;  %1296 = vst.msk [vmem:[%s3001_s2 + $0x120] sm:$0xff] %vm1259_vm0, %v1139_v24 }
  0xcd   :  { %v521_v29 = vpop.permute.xlu1 %520  ;;  %v516_v30 = vpop.permute.xlu0 %515 }
  0xce   :  { %v1142_v31 = vmul.f32 %v521_v29, %v50_v25  ;;  %v1141_v32 = vmul.f32 %v516_v30, %v49_v26  ;;  %840 = vperm.xlu1 %1422, %v270_v27   ;;  %835 = vperm.xlu0 %1421, %v269_v28   ;;  %v66_v25 = vld [vmem:[%s3000_s1 + $0x1b8] sm:$0xff]  ;;  %v65_v26 = vld [vmem:[%s3000_s1 + $0x1b0] sm:$0xff] }
  0xcf   :  { %v286_v27 = vld [vmem:[%s2999_s0 + $0x3b8] sm:$0xff]  ;;  %v285_v28 = vld [vmem:[%s2999_s0 + $0x3b0] sm:$0xff] }
  0xd0   :  { %1299 = vst.msk [vmem:[%s3001_s2 + $0x138] sm:$0xff] %vm1259_vm0, %v1142_v31  ;;  %1298 = vst.msk [vmem:[%s3001_s2 + $0x130] sm:$0xff] %vm1259_vm0, %v1141_v32 }
  0xd1   :  { %v531_v37 = vpop.permute.xlu1 %530  ;;  %v526_v38 = vpop.permute.xlu0 %525 }
  0xd2   :  { %v1144_v39 = vmul.f32 %v531_v37, %v52_v33  ;;  %v1143_v40 = vmul.f32 %v526_v38, %v51_v34  ;;  %850 = vperm.xlu1 %1422, %v272_v35   ;;  %845 = vperm.xlu0 %1421, %v271_v36   ;;  %v68_v33 = vld [vmem:[%s3000_s1 + $0x1c8] sm:$0xff]  ;;  %v67_v34 = vld [vmem:[%s3000_s1 + $0x1c0] sm:$0xff] }
  0xd3   :  { %v288_v35 = vld [vmem:[%s2999_s0 + $0x3c8] sm:$0xff]  ;;  %v287_v36 = vld [vmem:[%s2999_s0 + $0x3c0] sm:$0xff] }
  0xd4   :  { %1301 = vst.msk [vmem:[%s3001_s2 + $0x148] sm:$0xff] %vm1259_vm0, %v1144_v39  ;;  %1300 = vst.msk [vmem:[%s3001_s2 + $0x140] sm:$0xff] %vm1259_vm0, %v1143_v40 }
  0xd5   :  { %v541_v45 = vpop.permute.xlu1 %540  ;;  %v536_v46 = vpop.permute.xlu0 %535 }
  0xd6   :  { %v1146_v47 = vmul.f32 %v541_v45, %v54_v41  ;;  %v1145_v48 = vmul.f32 %v536_v46, %v53_v42  ;;  %860 = vperm.xlu1 %1422, %v274_v43   ;;  %855 = vperm.xlu0 %1421, %v273_v44   ;;  %v70_v41 = vld [vmem:[%s3000_s1 + $0x1d8] sm:$0xff]  ;;  %v69_v42 = vld [vmem:[%s3000_s1 + $0x1d0] sm:$0xff] }
  0xd7   :  { %v290_v43 = vld [vmem:[%s2999_s0 + $0x3d8] sm:$0xff]  ;;  %v289_v44 = vld [vmem:[%s2999_s0 + $0x3d0] sm:$0xff] }
  0xd8   :  { %1303 = vst.msk [vmem:[%s3001_s2 + $0x158] sm:$0xff] %vm1259_vm0, %v1146_v47  ;;  %1302 = vst.msk [vmem:[%s3001_s2 + $0x150] sm:$0xff] %vm1259_vm0, %v1145_v48 }
  0xd9   :  { %v551_v53 = vpop.permute.xlu1 %550  ;;  %v546_v54 = vpop.permute.xlu0 %545 }
  0xda   :  { %v1148_v55 = vmul.f32 %v551_v53, %v56_v49  ;;  %v1147_v56 = vmul.f32 %v546_v54, %v55_v50  ;;  %870 = vperm.xlu1 %1422, %v276_v51   ;;  %865 = vperm.xlu0 %1421, %v275_v52   ;;  %v72_v49 = vld [vmem:[%s3000_s1 + $0x1e8] sm:$0xff]  ;;  %v71_v50 = vld [vmem:[%s3000_s1 + $0x1e0] sm:$0xff] }
  0xdb   :  { %v292_v51 = vld [vmem:[%s2999_s0 + $0x3e8] sm:$0xff]  ;;  %v291_v52 = vld [vmem:[%s2999_s0 + $0x3e0] sm:$0xff] }
  0xdc   :  { %1305 = vst.msk [vmem:[%s3001_s2 + $0x168] sm:$0xff] %vm1259_vm0, %v1148_v55  ;;  %1304 = vst.msk [vmem:[%s3001_s2 + $0x160] sm:$0xff] %vm1259_vm0, %v1147_v56 }
  0xdd   :  { %v561_v61 = vpop.permute.xlu1 %560  ;;  %v556_v62 = vpop.permute.xlu0 %555 }
  0xde   :  { %v1150_v63 = vmul.f32 %v561_v61, %v58_v57  ;;  %v1149_v0 = vmul.f32 %v556_v62, %v57_v58  ;;  %880 = vperm.xlu1 %1422, %v278_v59   ;;  %875 = vperm.xlu0 %1421, %v277_v60   ;;  %v74_v57 = vld [vmem:[%s3000_s1 + $0x1f8] sm:$0xff]  ;;  %v73_v58 = vld [vmem:[%s3000_s1 + $0x1f0] sm:$0xff] }
  0xdf   :  { %v294_v59 = vld [vmem:[%s2999_s0 + $0x3f8] sm:$0xff]  ;;  %v293_v60 = vld [vmem:[%s2999_s0 + $0x3f0] sm:$0xff] }
  0xe0   :  { %1307 = vst.msk [vmem:[%s3001_s2 + $0x178] sm:$0xff] %vm1259_vm0, %v1150_v63  ;;  %1306 = vst.msk [vmem:[%s3001_s2 + $0x170] sm:$0xff] %vm1259_vm0, %v1149_v0 }
  0xe1   :  { %v571_v5 = vpop.permute.xlu1 %570  ;;  %v566_v6 = vpop.permute.xlu0 %565 }
  0xe2   :  { %v1152_v7 = vmul.f32 %v571_v5, %v60_v1  ;;  %v1151_v8 = vmul.f32 %v566_v6, %v59_v2  ;;  %890 = vperm.xlu1 %1422, %v280_v3   ;;  %885 = vperm.xlu0 %1421, %v279_v4   ;;  %v76_v1 = vld [vmem:[%s3000_s1 + $0x208] sm:$0xff]  ;;  %v75_v2 = vld [vmem:[%s3000_s1 + $0x200] sm:$0xff] }
  0xe3   :  { %v296_v3 = vld [vmem:[%s2999_s0 + $0x408] sm:$0xff]  ;;  %v295_v4 = vld [vmem:[%s2999_s0 + $0x400] sm:$0xff] }
  0xe4   :  { %1309 = vst.msk [vmem:[%s3001_s2 + $0x188] sm:$0xff] %vm1259_vm0, %v1152_v7  ;;  %1308 = vst.msk [vmem:[%s3001_s2 + $0x180] sm:$0xff] %vm1259_vm0, %v1151_v8 }
  0xe5   :  { %v581_v13 = vpop.permute.xlu1 %580  ;;  %v576_v14 = vpop.permute.xlu0 %575 }
  0xe6   :  { %v1154_v15 = vmul.f32 %v581_v13, %v62_v9  ;;  %v1153_v16 = vmul.f32 %v576_v14, %v61_v10  ;;  %900 = vperm.xlu1 %1422, %v282_v11   ;;  %895 = vperm.xlu0 %1421, %v281_v12   ;;  %v78_v9 = vld [vmem:[%s3000_s1 + $0x218] sm:$0xff]  ;;  %v77_v10 = vld [vmem:[%s3000_s1 + $0x210] sm:$0xff] }
  0xe7   :  { %v298_v11 = vld [vmem:[%s2999_s0 + $0x418] sm:$0xff]  ;;  %v297_v12 = vld [vmem:[%s2999_s0 + $0x410] sm:$0xff] }
  0xe8   :  { %1311 = vst.msk [vmem:[%s3001_s2 + $0x198] sm:$0xff] %vm1259_vm0, %v1154_v15  ;;  %1310 = vst.msk [vmem:[%s3001_s2 + $0x190] sm:$0xff] %vm1259_vm0, %v1153_v16 }
  0xe9   :  { %v591_v21 = vpop.permute.xlu1 %590  ;;  %v586_v22 = vpop.permute.xlu0 %585 }
  0xea   :  { %v1156_v23 = vmul.f32 %v591_v21, %v64_v17  ;;  %v1155_v24 = vmul.f32 %v586_v22, %v63_v18  ;;  %910 = vperm.xlu1 %1422, %v284_v19   ;;  %905 = vperm.xlu0 %1421, %v283_v20   ;;  %v80_v17 = vld [vmem:[%s3000_s1 + $0x228] sm:$0xff]  ;;  %v79_v18 = vld [vmem:[%s3000_s1 + $0x220] sm:$0xff] }
  0xeb   :  { %v300_v19 = vld [vmem:[%s2999_s0 + $0x428] sm:$0xff]  ;;  %v299_v20 = vld [vmem:[%s2999_s0 + $0x420] sm:$0xff] }
  0xec   :  { %1313 = vst.msk [vmem:[%s3001_s2 + $0x1a8] sm:$0xff] %vm1259_vm0, %v1156_v23  ;;  %1312 = vst.msk [vmem:[%s3001_s2 + $0x1a0] sm:$0xff] %vm1259_vm0, %v1155_v24 }
  0xed   :  { %v601_v29 = vpop.permute.xlu1 %600  ;;  %v596_v30 = vpop.permute.xlu0 %595 }
  0xee   :  { %v1158_v31 = vmul.f32 %v601_v29, %v66_v25  ;;  %v1157_v32 = vmul.f32 %v596_v30, %v65_v26  ;;  %920 = vperm.xlu1 %1422, %v286_v27   ;;  %915 = vperm.xlu0 %1421, %v285_v28   ;;  %v82_v25 = vld [vmem:[%s3000_s1 + $0x238] sm:$0xff]  ;;  %v81_v26 = vld [vmem:[%s3000_s1 + $0x230] sm:$0xff] }
  0xef   :  { %v302_v27 = vld [vmem:[%s2999_s0 + $0x438] sm:$0xff]  ;;  %v301_v28 = vld [vmem:[%s2999_s0 + $0x430] sm:$0xff] }
  0xf0   :  { %1315 = vst.msk [vmem:[%s3001_s2 + $0x1b8] sm:$0xff] %vm1259_vm0, %v1158_v31  ;;  %1314 = vst.msk [vmem:[%s3001_s2 + $0x1b0] sm:$0xff] %vm1259_vm0, %v1157_v32 }
  0xf1   :  { %v611_v37 = vpop.permute.xlu1 %610  ;;  %v606_v38 = vpop.permute.xlu0 %605 }
  0xf2   :  { %v1160_v39 = vmul.f32 %v611_v37, %v68_v33  ;;  %v1159_v40 = vmul.f32 %v606_v38, %v67_v34  ;;  %930 = vperm.xlu1 %1422, %v288_v35   ;;  %925 = vperm.xlu0 %1421, %v287_v36   ;;  %v84_v33 = vld [vmem:[%s3000_s1 + $0x248] sm:$0xff]  ;;  %v83_v34 = vld [vmem:[%s3000_s1 + $0x240] sm:$0xff] }
  0xf3   :  { %v304_v35 = vld [vmem:[%s2999_s0 + $0x448] sm:$0xff]  ;;  %v303_v36 = vld [vmem:[%s2999_s0 + $0x440] sm:$0xff] }
  0xf4   :  { %1317 = vst.msk [vmem:[%s3001_s2 + $0x1c8] sm:$0xff] %vm1259_vm0, %v1160_v39  ;;  %1316 = vst.msk [vmem:[%s3001_s2 + $0x1c0] sm:$0xff] %vm1259_vm0, %v1159_v40 }
  0xf5   :  { %v621_v45 = vpop.permute.xlu1 %620  ;;  %v616_v46 = vpop.permute.xlu0 %615 }
  0xf6   :  { %v1162_v47 = vmul.f32 %v621_v45, %v70_v41  ;;  %v1161_v48 = vmul.f32 %v616_v46, %v69_v42  ;;  %940 = vperm.xlu1 %1422, %v290_v43   ;;  %935 = vperm.xlu0 %1421, %v289_v44   ;;  %v86_v41 = vld [vmem:[%s3000_s1 + $0x258] sm:$0xff]  ;;  %v85_v42 = vld [vmem:[%s3000_s1 + $0x250] sm:$0xff] }
  0xf7   :  { %v306_v43 = vld [vmem:[%s2999_s0 + $0x458] sm:$0xff]  ;;  %v305_v44 = vld [vmem:[%s2999_s0 + $0x450] sm:$0xff] }
  0xf8   :  { %1319 = vst.msk [vmem:[%s3001_s2 + $0x1d8] sm:$0xff] %vm1259_vm0, %v1162_v47  ;;  %1318 = vst.msk [vmem:[%s3001_s2 + $0x1d0] sm:$0xff] %vm1259_vm0, %v1161_v48 }
  0xf9   :  { %v631_v53 = vpop.permute.xlu1 %630  ;;  %v626_v54 = vpop.permute.xlu0 %625 }
  0xfa   :  { %v1164_v55 = vmul.f32 %v631_v53, %v72_v49  ;;  %v1163_v56 = vmul.f32 %v626_v54, %v71_v50  ;;  %950 = vperm.xlu1 %1422, %v292_v51   ;;  %945 = vperm.xlu0 %1421, %v291_v52   ;;  %v88_v49 = vld [vmem:[%s3000_s1 + $0x268] sm:$0xff]  ;;  %v87_v50 = vld [vmem:[%s3000_s1 + $0x260] sm:$0xff] }
  0xfb   :  { %v308_v51 = vld [vmem:[%s2999_s0 + $0x468] sm:$0xff]  ;;  %v307_v52 = vld [vmem:[%s2999_s0 + $0x460] sm:$0xff] }
  0xfc   :  { %1321 = vst.msk [vmem:[%s3001_s2 + $0x1e8] sm:$0xff] %vm1259_vm0, %v1164_v55  ;;  %1320 = vst.msk [vmem:[%s3001_s2 + $0x1e0] sm:$0xff] %vm1259_vm0, %v1163_v56 }
  0xfd   :  { %v641_v61 = vpop.permute.xlu1 %640  ;;  %v636_v62 = vpop.permute.xlu0 %635 }
  0xfe   :  { %v1166_v63 = vmul.f32 %v641_v61, %v74_v57  ;;  %v1165_v0 = vmul.f32 %v636_v62, %v73_v58  ;;  %960 = vperm.xlu1 %1422, %v294_v59   ;;  %955 = vperm.xlu0 %1421, %v293_v60   ;;  %v90_v57 = vld [vmem:[%s3000_s1 + $0x278] sm:$0xff]  ;;  %v89_v58 = vld [vmem:[%s3000_s1 + $0x270] sm:$0xff] }
  0xff   :  { %v310_v59 = vld [vmem:[%s2999_s0 + $0x478] sm:$0xff]  ;;  %v309_v60 = vld [vmem:[%s2999_s0 + $0x470] sm:$0xff] }
 0x100   :  { %1323 = vst.msk [vmem:[%s3001_s2 + $0x1f8] sm:$0xff] %vm1259_vm0, %v1166_v63  ;;  %1322 = vst.msk [vmem:[%s3001_s2 + $0x1f0] sm:$0xff] %vm1259_vm0, %v1165_v0 }
 0x101   :  { %v651_v5 = vpop.permute.xlu1 %650  ;;  %v646_v6 = vpop.permute.xlu0 %645 }
 0x102   :  { %v1168_v7 = vmul.f32 %v651_v5, %v76_v1  ;;  %v1167_v8 = vmul.f32 %v646_v6, %v75_v2  ;;  %970 = vperm.xlu1 %1422, %v296_v3   ;;  %965 = vperm.xlu0 %1421, %v295_v4   ;;  %v92_v1 = vld [vmem:[%s3000_s1 + $0x288] sm:$0xff]  ;;  %v91_v2 = vld [vmem:[%s3000_s1 + $0x280] sm:$0xff] }
 0x103   :  { %v312_v3 = vld [vmem:[%s2999_s0 + $0x488] sm:$0xff]  ;;  %v311_v4 = vld [vmem:[%s2999_s0 + $0x480] sm:$0xff] }
 0x104   :  { %1325 = vst.msk [vmem:[%s3001_s2 + $0x208] sm:$0xff] %vm1259_vm0, %v1168_v7  ;;  %1324 = vst.msk [vmem:[%s3001_s2 + $0x200] sm:$0xff] %vm1259_vm0, %v1167_v8 }
 0x105   :  { %v661_v13 = vpop.permute.xlu1 %660  ;;  %v656_v14 = vpop.permute.xlu0 %655 }
 0x106   :  { %v1170_v15 = vmul.f32 %v661_v13, %v78_v9  ;;  %v1169_v16 = vmul.f32 %v656_v14, %v77_v10  ;;  %980 = vperm.xlu1 %1422, %v298_v11   ;;  %975 = vperm.xlu0 %1421, %v297_v12   ;;  %v94_v9 = vld [vmem:[%s3000_s1 + $0x298] sm:$0xff]  ;;  %v93_v10 = vld [vmem:[%s3000_s1 + $0x290] sm:$0xff] }
 0x107   :  { %v314_v11 = vld [vmem:[%s2999_s0 + $0x498] sm:$0xff]  ;;  %v313_v12 = vld [vmem:[%s2999_s0 + $0x490] sm:$0xff] }
 0x108   :  { %1327 = vst.msk [vmem:[%s3001_s2 + $0x218] sm:$0xff] %vm1259_vm0, %v1170_v15  ;;  %1326 = vst.msk [vmem:[%s3001_s2 + $0x210] sm:$0xff] %vm1259_vm0, %v1169_v16 }
 0x109   :  { %v671_v21 = vpop.permute.xlu1 %670  ;;  %v666_v22 = vpop.permute.xlu0 %665 }
 0x10a   :  { %v1172_v23 = vmul.f32 %v671_v21, %v80_v17  ;;  %v1171_v24 = vmul.f32 %v666_v22, %v79_v18  ;;  %990 = vperm.xlu1 %1422, %v300_v19   ;;  %985 = vperm.xlu0 %1421, %v299_v20   ;;  %v96_v17 = vld [vmem:[%s3000_s1 + $0x2a8] sm:$0xff]  ;;  %v95_v18 = vld [vmem:[%s3000_s1 + $0x2a0] sm:$0xff] }
 0x10b   :  { %v316_v19 = vld [vmem:[%s2999_s0 + $0x4a8] sm:$0xff]  ;;  %v315_v20 = vld [vmem:[%s2999_s0 + $0x4a0] sm:$0xff] }
 0x10c   :  { %1329 = vst.msk [vmem:[%s3001_s2 + $0x228] sm:$0xff] %vm1259_vm0, %v1172_v23  ;;  %1328 = vst.msk [vmem:[%s3001_s2 + $0x220] sm:$0xff] %vm1259_vm0, %v1171_v24 }
 0x10d   :  { %v681_v29 = vpop.permute.xlu1 %680  ;;  %v676_v30 = vpop.permute.xlu0 %675 }
 0x10e   :  { %v1174_v31 = vmul.f32 %v681_v29, %v82_v25  ;;  %v1173_v32 = vmul.f32 %v676_v30, %v81_v26  ;;  %1000 = vperm.xlu1 %1422, %v302_v27   ;;  %995 = vperm.xlu0 %1421, %v301_v28   ;;  %v98_v25 = vld [vmem:[%s3000_s1 + $0x2b8] sm:$0xff]  ;;  %v97_v26 = vld [vmem:[%s3000_s1 + $0x2b0] sm:$0xff] }
 0x10f   :  { %v318_v27 = vld [vmem:[%s2999_s0 + $0x4b8] sm:$0xff]  ;;  %v317_v28 = vld [vmem:[%s2999_s0 + $0x4b0] sm:$0xff] }
 0x110   :  { %1331 = vst.msk [vmem:[%s3001_s2 + $0x238] sm:$0xff] %vm1259_vm0, %v1174_v31  ;;  %1330 = vst.msk [vmem:[%s3001_s2 + $0x230] sm:$0xff] %vm1259_vm0, %v1173_v32 }
 0x111   :  { %v691_v37 = vpop.permute.xlu1 %690  ;;  %v686_v38 = vpop.permute.xlu0 %685 }
 0x112   :  { %v1176_v39 = vmul.f32 %v691_v37, %v84_v33  ;;  %v1175_v40 = vmul.f32 %v686_v38, %v83_v34  ;;  %1010 = vperm.xlu1 %1422, %v304_v35   ;;  %1005 = vperm.xlu0 %1421, %v303_v36   ;;  %v100_v33 = vld [vmem:[%s3000_s1 + $0x2c8] sm:$0xff]  ;;  %v99_v34 = vld [vmem:[%s3000_s1 + $0x2c0] sm:$0xff] }
 0x113   :  { %v320_v35 = vld [vmem:[%s2999_s0 + $0x4c8] sm:$0xff]  ;;  %v319_v36 = vld [vmem:[%s2999_s0 + $0x4c0] sm:$0xff] }
 0x114   :  { %1333 = vst.msk [vmem:[%s3001_s2 + $0x248] sm:$0xff] %vm1259_vm0, %v1176_v39  ;;  %1332 = vst.msk [vmem:[%s3001_s2 + $0x240] sm:$0xff] %vm1259_vm0, %v1175_v40 }
 0x115   :  { %v701_v45 = vpop.permute.xlu1 %700  ;;  %v696_v46 = vpop.permute.xlu0 %695 }
 0x116   :  { %v1178_v47 = vmul.f32 %v701_v45, %v86_v41  ;;  %v1177_v48 = vmul.f32 %v696_v46, %v85_v42  ;;  %1020 = vperm.xlu1 %1422, %v306_v43   ;;  %1015 = vperm.xlu0 %1421, %v305_v44   ;;  %v102_v41 = vld [vmem:[%s3000_s1 + $0x2d8] sm:$0xff]  ;;  %v101_v42 = vld [vmem:[%s3000_s1 + $0x2d0] sm:$0xff] }
 0x117   :  { %v322_v43 = vld [vmem:[%s2999_s0 + $0x4d8] sm:$0xff]  ;;  %v321_v44 = vld [vmem:[%s2999_s0 + $0x4d0] sm:$0xff] }
 0x118   :  { %1335 = vst.msk [vmem:[%s3001_s2 + $0x258] sm:$0xff] %vm1259_vm0, %v1178_v47  ;;  %1334 = vst.msk [vmem:[%s3001_s2 + $0x250] sm:$0xff] %vm1259_vm0, %v1177_v48 }
 0x119   :  { %v711_v53 = vpop.permute.xlu1 %710  ;;  %v706_v54 = vpop.permute.xlu0 %705 }
 0x11a   :  { %v1180_v55 = vmul.f32 %v711_v53, %v88_v49  ;;  %v1179_v56 = vmul.f32 %v706_v54, %v87_v50  ;;  %1030 = vperm.xlu1 %1422, %v308_v51   ;;  %1025 = vperm.xlu0 %1421, %v307_v52   ;;  %v104_v49 = vld [vmem:[%s3000_s1 + $0x2e8] sm:$0xff]  ;;  %v103_v50 = vld [vmem:[%s3000_s1 + $0x2e0] sm:$0xff] }
 0x11c   :  { %1337 = vst.msk [vmem:[%s3001_s2 + $0x268] sm:$0xff] %vm1259_vm0, %v1180_v55  ;;  %1336 = vst.msk [vmem:[%s3001_s2 + $0x260] sm:$0xff] %vm1259_vm0, %v1179_v56  ;;  %v106_v55 = vld [vmem:[%s3000_s1 + $0x2f8] sm:$0xff]  ;;  %v105_v56 = vld [vmem:[%s3000_s1 + $0x2f0] sm:$0xff] }
 0x11d   :  { %v721_v61 = vpop.permute.xlu1 %720  ;;  %v716_v62 = vpop.permute.xlu0 %715 }
 0x11e   :  { %v1182_v63 = vmul.f32 %v721_v61, %v90_v57  ;;  %v1181_v0 = vmul.f32 %v716_v62, %v89_v58  ;;  %1040 = vperm.xlu1 %1422, %v310_v59   ;;  %1035 = vperm.xlu0 %1421, %v309_v60   ;;  %v108_v61 = vld [vmem:[%s3000_s1 + $0x308] sm:$0xff]  ;;  %v107_v62 = vld [vmem:[%s3000_s1 + $0x300] sm:$0xff] }
 0x120   :  { %1339 = vst.msk [vmem:[%s3001_s2 + $0x278] sm:$0xff] %vm1259_vm0, %v1182_v63  ;;  %1338 = vst.msk [vmem:[%s3001_s2 + $0x270] sm:$0xff] %vm1259_vm0, %v1181_v0 }
 0x121   :  { %v731_v5 = vpop.permute.xlu1 %730  ;;  %v726_v6 = vpop.permute.xlu0 %725 }
 0x122   :  { %v1184_v7 = vmul.f32 %v731_v5, %v92_v1  ;;  %v1183_v8 = vmul.f32 %v726_v6, %v91_v2  ;;  %1050 = vperm.xlu1 %1422, %v312_v3   ;;  %1045 = vperm.xlu0 %1421, %v311_v4   ;;  %v110_v3 = vld [vmem:[%s3000_s1 + $0x318] sm:$0xff]  ;;  %v109_v4 = vld [vmem:[%s3000_s1 + $0x310] sm:$0xff] }
 0x124   :  { %1341 = vst.msk [vmem:[%s3001_s2 + $0x288] sm:$0xff] %vm1259_vm0, %v1184_v7  ;;  %1340 = vst.msk [vmem:[%s3001_s2 + $0x280] sm:$0xff] %vm1259_vm0, %v1183_v8 }
 0x125   :  { %v741_v13 = vpop.permute.xlu1 %740  ;;  %v736_v14 = vpop.permute.xlu0 %735 }
 0x126   :  { %v1186_v15 = vmul.f32 %v741_v13, %v94_v9  ;;  %v1185_v16 = vmul.f32 %v736_v14, %v93_v10  ;;  %1060 = vperm.xlu1 %1422, %v314_v11   ;;  %1055 = vperm.xlu0 %1421, %v313_v12   ;;  %v112_v9 = vld [vmem:[%s3000_s1 + $0x328] sm:$0xff]  ;;  %v111_v10 = vld [vmem:[%s3000_s1 + $0x320] sm:$0xff] }
 0x128   :  { %1343 = vst.msk [vmem:[%s3001_s2 + $0x298] sm:$0xff] %vm1259_vm0, %v1186_v15  ;;  %1342 = vst.msk [vmem:[%s3001_s2 + $0x290] sm:$0xff] %vm1259_vm0, %v1185_v16  ;;  %v114_v15 = vld [vmem:[%s3000_s1 + $0x338] sm:$0xff]  ;;  %v113_v16 = vld [vmem:[%s3000_s1 + $0x330] sm:$0xff] }
 0x129   :  { %v751_v21 = vpop.permute.xlu1 %750  ;;  %v746_v22 = vpop.permute.xlu0 %745 }
 0x12a   :  { %v1188_v23 = vmul.f32 %v751_v21, %v96_v17  ;;  %v1187_v24 = vmul.f32 %v746_v22, %v95_v18  ;;  %1070 = vperm.xlu1 %1422, %v316_v19   ;;  %1065 = vperm.xlu0 %1421, %v315_v20   ;;  %v116_v21 = vld [vmem:[%s3000_s1 + $0x348] sm:$0xff]  ;;  %v115_v22 = vld [vmem:[%s3000_s1 + $0x340] sm:$0xff] }
 0x12c   :  { %1345 = vst.msk [vmem:[%s3001_s2 + $0x2a8] sm:$0xff] %vm1259_vm0, %v1188_v23  ;;  %1344 = vst.msk [vmem:[%s3001_s2 + $0x2a0] sm:$0xff] %vm1259_vm0, %v1187_v24 }
 0x12d   :  { %v761_v29 = vpop.permute.xlu1 %760  ;;  %v756_v30 = vpop.permute.xlu0 %755 }
 0x12e   :  { %v1190_v31 = vmul.f32 %v761_v29, %v98_v25  ;;  %v1189_v32 = vmul.f32 %v756_v30, %v97_v26  ;;  %1080 = vperm.xlu1 %1422, %v318_v27   ;;  %1075 = vperm.xlu0 %1421, %v317_v28   ;;  %v118_v27 = vld [vmem:[%s3000_s1 + $0x358] sm:$0xff]  ;;  %v117_v28 = vld [vmem:[%s3000_s1 + $0x350] sm:$0xff] }
 0x130   :  { %1347 = vst.msk [vmem:[%s3001_s2 + $0x2b8] sm:$0xff] %vm1259_vm0, %v1190_v31  ;;  %1346 = vst.msk [vmem:[%s3001_s2 + $0x2b0] sm:$0xff] %vm1259_vm0, %v1189_v32 }
 0x131   :  { %v771_v37 = vpop.permute.xlu1 %770  ;;  %v766_v38 = vpop.permute.xlu0 %765 }
 0x132   :  { %v1192_v39 = vmul.f32 %v771_v37, %v100_v33  ;;  %v1191_v40 = vmul.f32 %v766_v38, %v99_v34  ;;  %1090 = vperm.xlu1 %1422, %v320_v35   ;;  %1085 = vperm.xlu0 %1421, %v319_v36   ;;  %v120_v33 = vld [vmem:[%s3000_s1 + $0x368] sm:$0xff]  ;;  %v119_v34 = vld [vmem:[%s3000_s1 + $0x360] sm:$0xff] }
 0x134   :  { %1349 = vst.msk [vmem:[%s3001_s2 + $0x2c8] sm:$0xff] %vm1259_vm0, %v1192_v39  ;;  %1348 = vst.msk [vmem:[%s3001_s2 + $0x2c0] sm:$0xff] %vm1259_vm0, %v1191_v40  ;;  %v122_v39 = vld [vmem:[%s3000_s1 + $0x378] sm:$0xff]  ;;  %v121_v40 = vld [vmem:[%s3000_s1 + $0x370] sm:$0xff] }
 0x135   :  { %v781_v45 = vpop.permute.xlu1 %780  ;;  %v776_v46 = vpop.permute.xlu0 %775 }
 0x136   :  { %v1194_v47 = vmul.f32 %v781_v45, %v102_v41  ;;  %v1193_v48 = vmul.f32 %v776_v46, %v101_v42  ;;  %1100 = vperm.xlu1 %1422, %v322_v43   ;;  %1095 = vperm.xlu0 %1421, %v321_v44   ;;  %v124_v45 = vld [vmem:[%s3000_s1 + $0x388] sm:$0xff]  ;;  %v123_v46 = vld [vmem:[%s3000_s1 + $0x380] sm:$0xff] }
 0x138   :  { %1351 = vst.msk [vmem:[%s3001_s2 + $0x2d8] sm:$0xff] %vm1259_vm0, %v1194_v47  ;;  %1350 = vst.msk [vmem:[%s3001_s2 + $0x2d0] sm:$0xff] %vm1259_vm0, %v1193_v48 }
 0x139   :  { %v791_v51 = vpop.permute.xlu1 %790  ;;  %v786_v52 = vpop.permute.xlu0 %785 }
 0x13a   :  { %v1196_v53 = vmul.f32 %v791_v51, %v104_v49  ;;  %v1195_v54 = vmul.f32 %v786_v52, %v103_v50  ;;  %v126_v51 = vld [vmem:[%s3000_s1 + $0x398] sm:$0xff]  ;;  %v125_v52 = vld [vmem:[%s3000_s1 + $0x390] sm:$0xff] }
 0x13c   :  { %1353 = vst.msk [vmem:[%s3001_s2 + $0x2e8] sm:$0xff] %vm1259_vm0, %v1196_v53  ;;  %1352 = vst.msk [vmem:[%s3001_s2 + $0x2e0] sm:$0xff] %vm1259_vm0, %v1195_v54 }
 0x13d   :  { %v801_v57 = vpop.permute.xlu1 %800  ;;  %v796_v58 = vpop.permute.xlu0 %795 }
 0x13e   :  { %v1198_v59 = vmul.f32 %v801_v57, %v106_v55  ;;  %v1197_v60 = vmul.f32 %v796_v58, %v105_v56  ;;  %v128_v57 = vld [vmem:[%s3000_s1 + $0x3a8] sm:$0xff]  ;;  %v127_v58 = vld [vmem:[%s3000_s1 + $0x3a0] sm:$0xff] }
 0x140   :  { %1355 = vst.msk [vmem:[%s3001_s2 + $0x2f8] sm:$0xff] %vm1259_vm0, %v1198_v59  ;;  %1354 = vst.msk [vmem:[%s3001_s2 + $0x2f0] sm:$0xff] %vm1259_vm0, %v1197_v60 }
 0x141   :  { %v811_v63 = vpop.permute.xlu1 %810  ;;  %v806_v0 = vpop.permute.xlu0 %805 }
 0x142   :  { %v1200_v1 = vmul.f32 %v811_v63, %v108_v61  ;;  %v1199_v2 = vmul.f32 %v806_v0, %v107_v62  ;;  %v130_v63 = vld [vmem:[%s3000_s1 + $0x3b8] sm:$0xff]  ;;  %v129_v0 = vld [vmem:[%s3000_s1 + $0x3b0] sm:$0xff] }
 0x144   :  { %1357 = vst.msk [vmem:[%s3001_s2 + $0x308] sm:$0xff] %vm1259_vm0, %v1200_v1  ;;  %1356 = vst.msk [vmem:[%s3001_s2 + $0x300] sm:$0xff] %vm1259_vm0, %v1199_v2 }
 0x145   :  { %v821_v5 = vpop.permute.xlu1 %820  ;;  %v816_v6 = vpop.permute.xlu0 %815 }
 0x146   :  { %v1202_v7 = vmul.f32 %v821_v5, %v110_v3  ;;  %v1201_v8 = vmul.f32 %v816_v6, %v109_v4  ;;  %v132_v5 = vld [vmem:[%s3000_s1 + $0x3c8] sm:$0xff]  ;;  %v131_v6 = vld [vmem:[%s3000_s1 + $0x3c0] sm:$0xff] }
 0x148   :  { %1359 = vst.msk [vmem:[%s3001_s2 + $0x318] sm:$0xff] %vm1259_vm0, %v1202_v7  ;;  %1358 = vst.msk [vmem:[%s3001_s2 + $0x310] sm:$0xff] %vm1259_vm0, %v1201_v8 }
 0x149   :  { %v831_v11 = vpop.permute.xlu1 %830  ;;  %v826_v12 = vpop.permute.xlu0 %825 }
 0x14a   :  { %v1204_v13 = vmul.f32 %v831_v11, %v112_v9  ;;  %v1203_v14 = vmul.f32 %v826_v12, %v111_v10  ;;  %v134_v11 = vld [vmem:[%s3000_s1 + $0x3d8] sm:$0xff]  ;;  %v133_v12 = vld [vmem:[%s3000_s1 + $0x3d0] sm:$0xff] }
 0x14c   :  { %1361 = vst.msk [vmem:[%s3001_s2 + $0x328] sm:$0xff] %vm1259_vm0, %v1204_v13  ;;  %1360 = vst.msk [vmem:[%s3001_s2 + $0x320] sm:$0xff] %vm1259_vm0, %v1203_v14 }
 0x14d   :  { %v841_v17 = vpop.permute.xlu1 %840  ;;  %v836_v18 = vpop.permute.xlu0 %835 }
 0x14e   :  { %v1206_v19 = vmul.f32 %v841_v17, %v114_v15  ;;  %v1205_v20 = vmul.f32 %v836_v18, %v113_v16  ;;  %v136_v17 = vld [vmem:[%s3000_s1 + $0x3e8] sm:$0xff]  ;;  %v135_v18 = vld [vmem:[%s3000_s1 + $0x3e0] sm:$0xff] }
 0x150   :  { %1363 = vst.msk [vmem:[%s3001_s2 + $0x338] sm:$0xff] %vm1259_vm0, %v1206_v19  ;;  %1362 = vst.msk [vmem:[%s3001_s2 + $0x330] sm:$0xff] %vm1259_vm0, %v1205_v20 }
 0x151   :  { %v851_v23 = vpop.permute.xlu1 %850  ;;  %v846_v24 = vpop.permute.xlu0 %845 }
 0x152   :  { %v1208_v25 = vmul.f32 %v851_v23, %v116_v21  ;;  %v1207_v26 = vmul.f32 %v846_v24, %v115_v22  ;;  %v138_v23 = vld [vmem:[%s3000_s1 + $0x3f8] sm:$0xff]  ;;  %v137_v24 = vld [vmem:[%s3000_s1 + $0x3f0] sm:$0xff] }
 0x154   :  { %1365 = vst.msk [vmem:[%s3001_s2 + $0x348] sm:$0xff] %vm1259_vm0, %v1208_v25  ;;  %1364 = vst.msk [vmem:[%s3001_s2 + $0x340] sm:$0xff] %vm1259_vm0, %v1207_v26 }
 0x155   :  { %v861_v29 = vpop.permute.xlu1 %860  ;;  %v856_v30 = vpop.permute.xlu0 %855 }
 0x156   :  { %v1210_v31 = vmul.f32 %v861_v29, %v118_v27  ;;  %v1209_v32 = vmul.f32 %v856_v30, %v117_v28  ;;  %v140_v29 = vld [vmem:[%s3000_s1 + $0x408] sm:$0xff]  ;;  %v139_v30 = vld [vmem:[%s3000_s1 + $0x400] sm:$0xff] }
 0x158   :  { %1367 = vst.msk [vmem:[%s3001_s2 + $0x358] sm:$0xff] %vm1259_vm0, %v1210_v31  ;;  %1366 = vst.msk [vmem:[%s3001_s2 + $0x350] sm:$0xff] %vm1259_vm0, %v1209_v32 }
 0x159   :  { %v871_v35 = vpop.permute.xlu1 %870  ;;  %v866_v36 = vpop.permute.xlu0 %865 }
 0x15a   :  { %v1212_v37 = vmul.f32 %v871_v35, %v120_v33  ;;  %v1211_v38 = vmul.f32 %v866_v36, %v119_v34  ;;  %v142_v35 = vld [vmem:[%s3000_s1 + $0x418] sm:$0xff]  ;;  %v141_v36 = vld [vmem:[%s3000_s1 + $0x410] sm:$0xff] }
 0x15c   :  { %1369 = vst.msk [vmem:[%s3001_s2 + $0x368] sm:$0xff] %vm1259_vm0, %v1212_v37  ;;  %1368 = vst.msk [vmem:[%s3001_s2 + $0x360] sm:$0xff] %vm1259_vm0, %v1211_v38 }
 0x15d   :  { %v881_v41 = vpop.permute.xlu1 %880  ;;  %v876_v42 = vpop.permute.xlu0 %875 }
 0x15e   :  { %v1214_v43 = vmul.f32 %v881_v41, %v122_v39  ;;  %v1213_v44 = vmul.f32 %v876_v42, %v121_v40  ;;  %v144_v41 = vld [vmem:[%s3000_s1 + $0x428] sm:$0xff]  ;;  %v143_v42 = vld [vmem:[%s3000_s1 + $0x420] sm:$0xff] }
 0x160   :  { %1371 = vst.msk [vmem:[%s3001_s2 + $0x378] sm:$0xff] %vm1259_vm0, %v1214_v43  ;;  %1370 = vst.msk [vmem:[%s3001_s2 + $0x370] sm:$0xff] %vm1259_vm0, %v1213_v44 }
 0x161   :  { %v891_v47 = vpop.permute.xlu1 %890  ;;  %v886_v48 = vpop.permute.xlu0 %885 }
 0x162   :  { %v1216_v49 = vmul.f32 %v891_v47, %v124_v45  ;;  %v1215_v50 = vmul.f32 %v886_v48, %v123_v46  ;;  %v146_v47 = vld [vmem:[%s3000_s1 + $0x438] sm:$0xff]  ;;  %v145_v48 = vld [vmem:[%s3000_s1 + $0x430] sm:$0xff] }
 0x164   :  { %1373 = vst.msk [vmem:[%s3001_s2 + $0x388] sm:$0xff] %vm1259_vm0, %v1216_v49  ;;  %1372 = vst.msk [vmem:[%s3001_s2 + $0x380] sm:$0xff] %vm1259_vm0, %v1215_v50 }
 0x165   :  { %v901_v53 = vpop.permute.xlu1 %900  ;;  %v896_v54 = vpop.permute.xlu0 %895 }
 0x166   :  { %v1218_v55 = vmul.f32 %v901_v53, %v126_v51  ;;  %v1217_v56 = vmul.f32 %v896_v54, %v125_v52  ;;  %v148_v53 = vld [vmem:[%s3000_s1 + $0x448] sm:$0xff]  ;;  %v147_v54 = vld [vmem:[%s3000_s1 + $0x440] sm:$0xff] }
 0x168   :  { %1375 = vst.msk [vmem:[%s3001_s2 + $0x398] sm:$0xff] %vm1259_vm0, %v1218_v55  ;;  %1374 = vst.msk [vmem:[%s3001_s2 + $0x390] sm:$0xff] %vm1259_vm0, %v1217_v56 }
 0x169   :  { %v911_v59 = vpop.permute.xlu1 %910  ;;  %v906_v60 = vpop.permute.xlu0 %905 }
 0x16a   :  { %v1220_v61 = vmul.f32 %v911_v59, %v128_v57  ;;  %v1219_v62 = vmul.f32 %v906_v60, %v127_v58  ;;  %v150_v59 = vld [vmem:[%s3000_s1 + $0x458] sm:$0xff]  ;;  %v149_v60 = vld [vmem:[%s3000_s1 + $0x450] sm:$0xff] }
 0x16c   :  { %1377 = vst.msk [vmem:[%s3001_s2 + $0x3a8] sm:$0xff] %vm1259_vm0, %v1220_v61  ;;  %1376 = vst.msk [vmem:[%s3001_s2 + $0x3a0] sm:$0xff] %vm1259_vm0, %v1219_v62 }
 0x16d   :  { %v921_v1 = vpop.permute.xlu1 %920  ;;  %v916_v2 = vpop.permute.xlu0 %915 }
 0x16e   :  { %v1222_v3 = vmul.f32 %v921_v1, %v130_v63  ;;  %v1221_v4 = vmul.f32 %v916_v2, %v129_v0  ;;  %v152_v1 = vld [vmem:[%s3000_s1 + $0x468] sm:$0xff]  ;;  %v151_v2 = vld [vmem:[%s3000_s1 + $0x460] sm:$0xff] }
 0x170   :  { %1379 = vst.msk [vmem:[%s3001_s2 + $0x3b8] sm:$0xff] %vm1259_vm0, %v1222_v3  ;;  %1378 = vst.msk [vmem:[%s3001_s2 + $0x3b0] sm:$0xff] %vm1259_vm0, %v1221_v4 }
 0x171   :  { %v931_v7 = vpop.permute.xlu1 %930  ;;  %v926_v8 = vpop.permute.xlu0 %925 }
 0x172   :  { %v1224_v9 = vmul.f32 %v931_v7, %v132_v5  ;;  %v1223_v10 = vmul.f32 %v926_v8, %v131_v6  ;;  %v154_v7 = vld [vmem:[%s3000_s1 + $0x478] sm:$0xff]  ;;  %v153_v8 = vld [vmem:[%s3000_s1 + $0x470] sm:$0xff] }
 0x174   :  { %1381 = vst.msk [vmem:[%s3001_s2 + $0x3c8] sm:$0xff] %vm1259_vm0, %v1224_v9  ;;  %1380 = vst.msk [vmem:[%s3001_s2 + $0x3c0] sm:$0xff] %vm1259_vm0, %v1223_v10 }
 0x175   :  { %v941_v13 = vpop.permute.xlu1 %940  ;;  %v936_v14 = vpop.permute.xlu0 %935 }
 0x176   :  { %v1226_v15 = vmul.f32 %v941_v13, %v134_v11  ;;  %v1225_v16 = vmul.f32 %v936_v14, %v133_v12  ;;  %v156_v13 = vld [vmem:[%s3000_s1 + $0x488] sm:$0xff]  ;;  %v155_v14 = vld [vmem:[%s3000_s1 + $0x480] sm:$0xff] }
 0x178   :  { %1383 = vst.msk [vmem:[%s3001_s2 + $0x3d8] sm:$0xff] %vm1259_vm0, %v1226_v15  ;;  %1382 = vst.msk [vmem:[%s3001_s2 + $0x3d0] sm:$0xff] %vm1259_vm0, %v1225_v16 }
 0x179   :  { %v951_v19 = vpop.permute.xlu1 %950  ;;  %v946_v20 = vpop.permute.xlu0 %945 }
 0x17a   :  { %v1228_v21 = vmul.f32 %v951_v19, %v136_v17  ;;  %v1227_v22 = vmul.f32 %v946_v20, %v135_v18  ;;  %v158_v19 = vld [vmem:[%s3000_s1 + $0x498] sm:$0xff]  ;;  %v157_v20 = vld [vmem:[%s3000_s1 + $0x490] sm:$0xff] }
 0x17c   :  { %1385 = vst.msk [vmem:[%s3001_s2 + $0x3e8] sm:$0xff] %vm1259_vm0, %v1228_v21  ;;  %1384 = vst.msk [vmem:[%s3001_s2 + $0x3e0] sm:$0xff] %vm1259_vm0, %v1227_v22 }
 0x17d   :  { %v961_v25 = vpop.permute.xlu1 %960  ;;  %v956_v26 = vpop.permute.xlu0 %955 }
 0x17e   :  { %v1230_v27 = vmul.f32 %v961_v25, %v138_v23  ;;  %v1229_v28 = vmul.f32 %v956_v26, %v137_v24  ;;  %v160_v25 = vld [vmem:[%s3000_s1 + $0x4a8] sm:$0xff]  ;;  %v159_v26 = vld [vmem:[%s3000_s1 + $0x4a0] sm:$0xff] }
 0x180   :  { %1387 = vst.msk [vmem:[%s3001_s2 + $0x3f8] sm:$0xff] %vm1259_vm0, %v1230_v27  ;;  %1386 = vst.msk [vmem:[%s3001_s2 + $0x3f0] sm:$0xff] %vm1259_vm0, %v1229_v28 }
 0x181   :  { %v971_v31 = vpop.permute.xlu1 %970  ;;  %v966_v32 = vpop.permute.xlu0 %965 }
 0x182   :  { %v1232_v33 = vmul.f32 %v971_v31, %v140_v29  ;;  %v1231_v34 = vmul.f32 %v966_v32, %v139_v30  ;;  %v162_v31 = vld [vmem:[%s3000_s1 + $0x4b8] sm:$0xff]  ;;  %v161_v32 = vld [vmem:[%s3000_s1 + $0x4b0] sm:$0xff] }
 0x184   :  { %1389 = vst.msk [vmem:[%s3001_s2 + $0x408] sm:$0xff] %vm1259_vm0, %v1232_v33  ;;  %1388 = vst.msk [vmem:[%s3001_s2 + $0x400] sm:$0xff] %vm1259_vm0, %v1231_v34 }
 0x185   :  { %v981_v37 = vpop.permute.xlu1 %980  ;;  %v976_v38 = vpop.permute.xlu0 %975 }
 0x186   :  { %v1234_v39 = vmul.f32 %v981_v37, %v142_v35  ;;  %v1233_v40 = vmul.f32 %v976_v38, %v141_v36  ;;  %v164_v37 = vld [vmem:[%s3000_s1 + $0x4c8] sm:$0xff]  ;;  %v163_v38 = vld [vmem:[%s3000_s1 + $0x4c0] sm:$0xff] }
 0x188   :  { %1391 = vst.msk [vmem:[%s3001_s2 + $0x418] sm:$0xff] %vm1259_vm0, %v1234_v39  ;;  %1390 = vst.msk [vmem:[%s3001_s2 + $0x410] sm:$0xff] %vm1259_vm0, %v1233_v40 }
 0x189   :  { %v991_v43 = vpop.permute.xlu1 %990  ;;  %v986_v44 = vpop.permute.xlu0 %985 }
 0x18a   :  { %v1236_v45 = vmul.f32 %v991_v43, %v144_v41  ;;  %v1235_v46 = vmul.f32 %v986_v44, %v143_v42  ;;  %v166_v43 = vld [vmem:[%s3000_s1 + $0x4d8] sm:$0xff]  ;;  %v165_v44 = vld [vmem:[%s3000_s1 + $0x4d0] sm:$0xff] }
 0x18c   :  { %1393 = vst.msk [vmem:[%s3001_s2 + $0x428] sm:$0xff] %vm1259_vm0, %v1236_v45  ;;  %1392 = vst.msk [vmem:[%s3001_s2 + $0x420] sm:$0xff] %vm1259_vm0, %v1235_v46 }
 0x18d   :  { %v1001_v49 = vpop.permute.xlu1 %1000  ;;  %v996_v50 = vpop.permute.xlu0 %995 }
 0x18e   :  { %v1238_v51 = vmul.f32 %v1001_v49, %v146_v47  ;;  %v1237_v52 = vmul.f32 %v996_v50, %v145_v48 }
 0x190   :  { %1395 = vst.msk [vmem:[%s3001_s2 + $0x438] sm:$0xff] %vm1259_vm0, %v1238_v51  ;;  %1394 = vst.msk [vmem:[%s3001_s2 + $0x430] sm:$0xff] %vm1259_vm0, %v1237_v52 }
 0x191   :  { %v1011_v55 = vpop.permute.xlu1 %1010  ;;  %v1006_v56 = vpop.permute.xlu0 %1005 }
 0x192   :  { %v1240_v57 = vmul.f32 %v1011_v55, %v148_v53  ;;  %v1239_v58 = vmul.f32 %v1006_v56, %v147_v54 }
 0x194   :  { %1397 = vst.msk [vmem:[%s3001_s2 + $0x448] sm:$0xff] %vm1259_vm0, %v1240_v57  ;;  %1396 = vst.msk [vmem:[%s3001_s2 + $0x440] sm:$0xff] %vm1259_vm0, %v1239_v58 }
 0x195   :  { %v1021_v61 = vpop.permute.xlu1 %1020  ;;  %v1016_v62 = vpop.permute.xlu0 %1015 }
 0x196   :  { %v1242_v63 = vmul.f32 %v1021_v61, %v150_v59  ;;  %v1241_v0 = vmul.f32 %v1016_v62, %v149_v60 }
 0x198   :  { %1399 = vst.msk [vmem:[%s3001_s2 + $0x458] sm:$0xff] %vm1259_vm0, %v1242_v63  ;;  %1398 = vst.msk [vmem:[%s3001_s2 + $0x450] sm:$0xff] %vm1259_vm0, %v1241_v0 }
 0x199   :  { %v1031_v3 = vpop.permute.xlu1 %1030  ;;  %v1026_v4 = vpop.permute.xlu0 %1025 }
 0x19a   :  { %v1244_v5 = vmul.f32 %v1031_v3, %v152_v1  ;;  %v1243_v6 = vmul.f32 %v1026_v4, %v151_v2 }
 0x19c   :  { %1401 = vst.msk [vmem:[%s3001_s2 + $0x468] sm:$0xff] %vm1259_vm0, %v1244_v5  ;;  %1400 = vst.msk [vmem:[%s3001_s2 + $0x460] sm:$0xff] %vm1259_vm0, %v1243_v6 }
 0x19d   :  { %v1041_v9 = vpop.permute.xlu1 %1040  ;;  %v1036_v10 = vpop.permute.xlu0 %1035 }
 0x19e   :  { %v1246_v11 = vmul.f32 %v1041_v9, %v154_v7  ;;  %v1245_v12 = vmul.f32 %v1036_v10, %v153_v8 }
 0x1a0   :  { %1403 = vst.msk [vmem:[%s3001_s2 + $0x478] sm:$0xff] %vm1259_vm0, %v1246_v11  ;;  %1402 = vst.msk [vmem:[%s3001_s2 + $0x470] sm:$0xff] %vm1259_vm0, %v1245_v12 }
 0x1a1   :  { %v1051_v15 = vpop.permute.xlu1 %1050  ;;  %v1046_v16 = vpop.permute.xlu0 %1045 }
 0x1a2   :  { %v1248_v17 = vmul.f32 %v1051_v15, %v156_v13  ;;  %v1247_v18 = vmul.f32 %v1046_v16, %v155_v14 }
 0x1a4   :  { %1405 = vst.msk [vmem:[%s3001_s2 + $0x488] sm:$0xff] %vm1259_vm0, %v1248_v17  ;;  %1404 = vst.msk [vmem:[%s3001_s2 + $0x480] sm:$0xff] %vm1259_vm0, %v1247_v18 }
 0x1a5   :  { %v1061_v21 = vpop.permute.xlu1 %1060  ;;  %v1056_v22 = vpop.permute.xlu0 %1055 }
 0x1a6   :  { %v1250_v23 = vmul.f32 %v1061_v21, %v158_v19  ;;  %v1249_v24 = vmul.f32 %v1056_v22, %v157_v20 }
 0x1a8   :  { %1407 = vst.msk [vmem:[%s3001_s2 + $0x498] sm:$0xff] %vm1259_vm0, %v1250_v23  ;;  %1406 = vst.msk [vmem:[%s3001_s2 + $0x490] sm:$0xff] %vm1259_vm0, %v1249_v24 }
 0x1a9   :  { %v1071_v27 = vpop.permute.xlu1 %1070  ;;  %v1066_v28 = vpop.permute.xlu0 %1065 }
 0x1aa   :  { %v1252_v29 = vmul.f32 %v1071_v27, %v160_v25  ;;  %v1251_v30 = vmul.f32 %v1066_v28, %v159_v26 }
 0x1ac   :  { %1409 = vst.msk [vmem:[%s3001_s2 + $0x4a8] sm:$0xff] %vm1259_vm0, %v1252_v29  ;;  %1408 = vst.msk [vmem:[%s3001_s2 + $0x4a0] sm:$0xff] %vm1259_vm0, %v1251_v30 }
 0x1ad   :  { %v1081_v33 = vpop.permute.xlu1 %1080  ;;  %v1076_v34 = vpop.permute.xlu0 %1075 }
 0x1ae   :  { %v1254_v35 = vmul.f32 %v1081_v33, %v162_v31  ;;  %v1253_v36 = vmul.f32 %v1076_v34, %v161_v32 }
 0x1b0   :  { %1411 = vst.msk [vmem:[%s3001_s2 + $0x4b8] sm:$0xff] %vm1259_vm0, %v1254_v35  ;;  %1410 = vst.msk [vmem:[%s3001_s2 + $0x4b0] sm:$0xff] %vm1259_vm0, %v1253_v36 }
 0x1b1   :  { %v1091_v39 = vpop.permute.xlu1 %1090  ;;  %v1086_v40 = vpop.permute.xlu0 %1085 }
 0x1b2   :  { %v1256_v41 = vmul.f32 %v1091_v39, %v164_v37  ;;  %v1255_v42 = vmul.f32 %v1086_v40, %v163_v38 }
 0x1b4   :  { %1413 = vst.msk [vmem:[%s3001_s2 + $0x4c8] sm:$0xff] %vm1259_vm0, %v1256_v41  ;;  %1412 = vst.msk [vmem:[%s3001_s2 + $0x4c0] sm:$0xff] %vm1259_vm0, %v1255_v42 }
 0x1b5   :  { %v1101_v45 = vpop.permute.xlu1 %1100  ;;  %v1096_v46 = vpop.permute.xlu0 %1095 }
 0x1b6   :  { %v1258_v47 = vmul.f32 %v1101_v45, %v166_v43  ;;  %v1257_v48 = vmul.f32 %v1096_v46, %v165_v44 }
 0x1b8   :  { %1415 = vst.msk [vmem:[%s3001_s2 + $0x4d8] sm:$0xff] %vm1259_vm0, %v1258_v47  ;;  %1414 = vst.msk [vmem:[%s3001_s2 + $0x4d0] sm:$0xff] %vm1259_vm0, %v1257_v48 }

</bundles_post_ra>
